<compile_context>
chip_gen: v5e
topology: v5e:2x2
jax: 0.10.0
libtpu: 0.0.40
codegen_flags: <defaults>
</compile_context>

<pallas_src>
import functools
import math

import jax
import jax.numpy as jnp
from jax.experimental import pallas as pl
from jax.experimental.pallas import tpu as pltpu

LANE = 128            # TPU lane width (last-dim tile)
MAX_TM = 512          # max rows per matmul grid step
K_SINGLE_MAX = 4096   # contract dim below which K stays in a single block


def _round_up(x, m):
    return ((x + m - 1) // m) * m


# ----------------------------------------------------------------------------
# Pallas matmul kernel: (M, K) @ (K, Np) + bias with fused activation epilogue.
# ----------------------------------------------------------------------------
def _epilogue_write(outs, acc, b_ref, act, dual):
    acc = acc + b_ref[...]                      # f32 epilogue (v5e friendly)
    if act == "relu":
        acc = jnp.maximum(acc, 0.0)
    elif act == "sigmoid":
        acc = jax.nn.sigmoid(acc)
    outs[0][...] = acc.astype(outs[0].dtype)
    if dual:                                    # fused sigmoid second output
        outs[1][...] = jax.nn.sigmoid(acc).astype(outs[1].dtype)


def _mm_kernel(x_ref, w_ref, b_ref, *rest, act, dual, n_k):
    n_out = 2 if dual else 1
    outs = rest[:n_out]
    acc_ref = rest[n_out] if len(rest) > n_out else None

    if acc_ref is None:
        # Whole contraction resident: one MXU pass + fused epilogue.
        acc = jnp.dot(x_ref[...], w_ref[...], preferred_element_type=jnp.float32)
        _epilogue_write(outs, acc, b_ref, act, dual)
    else:
        @pl.when(pl.program_id(1) == 0)
        def _init():
            acc_ref[...] = jnp.zeros_like(acc_ref)

        acc_ref[...] += jnp.dot(x_ref[...], w_ref[...],
                                preferred_element_type=jnp.float32)

        @pl.when(pl.program_id(1) == n_k - 1)
        def _finish():
            _epilogue_write(outs, acc_ref[...], b_ref, act, dual)


def _choose_tm(M):
    # Full-extent block for small M (layout-legal for any M); otherwise >= 2
    # tiles so the 'parallel' axis can feed both TensorCores on megacore parts,
    # with 16-aligned rows so bf16 input blocks respect the (16, 128) tiling.
    if M <= 256:
        return M
    return min(MAX_TM, _round_up((M + 1) // 2, 16))


def matmul_bias_act(x, w, b, act="none", dual_sigmoid=False):
    """x: (M, K); w: (K, Np) with Np % 128 == 0; b: (Np,) f32.

    Returns f32 (M, Np), or (linear, sigmoid(linear)) if dual_sigmoid.
    MXU inputs are cast to bf16; accumulation and epilogue stay f32."""
    M, K = x.shape
    Kw, Np = w.shape
    assert K == Kw and Np % LANE == 0
    x = x.astype(jnp.bfloat16)
    w = w.astype(jnp.bfloat16)
    b2 = b.reshape(1, Np).astype(jnp.float32)

    tm = _choose_tm(M)
    grid_m = pl.cdiv(M, tm)

    if K <= K_SINGLE_MAX:
        tk = K
    else:
        tk = 2048
        Kp = _round_up(K, tk)
        if Kp != K:        # zero-pad the contraction (safe for accumulation)
            x = jnp.pad(x, ((0, 0), (0, Kp - K)))
            w = jnp.pad(w, ((0, Kp - K), (0, 0)))
        K = Kp
    grid_k = K // tk

    n_out = 2 if dual_sigmoid else 1
    out_struct = jax.ShapeDtypeStruct((M, Np), jnp.float32)
    out_spec = pl.BlockSpec((tm, Np), lambda i, k: (i, 0))
    scratch = [] if grid_k == 1 else [pltpu.VMEM((tm, Np), jnp.float32)]

    # Rough per-step VMEM footprint: double-buffered ins/outs + accumulator.
    est = 2 * (tm * tk * 2 + tk * Np * 2 + Np * 4 + n_out * tm * Np * 4) \
        + tm * Np * 4
    vlim = int(min(64 * 2 ** 20, max(32 * 2 ** 20, 2 * est)))

    kernel = functools.partial(_mm_kernel, act=act, dual=dual_sigmoid,
                               n_k=grid_k)
    out = pl.pallas_call(
        kernel,
        out_shape=(out_struct, out_struct) if dual_sigmoid else out_struct,
        grid=(grid_m, grid_k),
        in_specs=[
            pl.BlockSpec((tm, tk), lambda i, k: (i, k)),
            pl.BlockSpec((tk, Np), lambda i, k: (k, 0)),
            pl.BlockSpec((1, Np), lambda i, k: (0, 0)),
        ],
        out_specs=(out_spec, out_spec) if dual_sigmoid else out_spec,
        scratch_shapes=scratch,
        compiler_params=pltpu.CompilerParams(
            dimension_semantics=("parallel", "arbitrary"),
            vmem_limit_bytes=vlim),
    )(x, w, b2)
    return out


# ----------------------------------------------------------------------------
# Reparameterize (tiny elementwise Pallas kernel, full-array block).
# ----------------------------------------------------------------------------
def _reparam_kernel(mu_ref, logvar_ref, eps_ref, z_ref):
    z_ref[...] = mu_ref[...] + eps_ref[...] * jnp.exp(0.5 * logvar_ref[...])


def reparameterize_pallas(mu2d, logvar2d, eps2d):
    return pl.pallas_call(
        _reparam_kernel,
        out_shape=jax.ShapeDtypeStruct(mu2d.shape, jnp.float32),
    )(mu2d.astype(jnp.float32), logvar2d.astype(jnp.float32),
      eps2d.astype(jnp.float32))


# ----------------------------------------------------------------------------
# Channel-last Conv3d / phase-decomposed ConvTranspose3d.
# ----------------------------------------------------------------------------
def conv3d_cl(x_cl, wmat, bias_p, cout, ksize, stride, padding,
              act="none", dual_sigmoid=False):
    """Channel-last Conv3d via im2col + Pallas matmul.

    x_cl: (N, D, H, W, C); wmat: (kd*kh*kw*C, Np) bf16 with K ordered
    (dz, dy, dx, c); bias_p: (Np,) f32, Np a multiple of 128.
    Returns (N, Do, Ho, Wo, cout) f32 (a pair if dual_sigmoid)."""
    kd, kh, kw = ksize
    sd, sh, sw = stride
    pd, ph, pw = padding
    x_cl = x_cl.astype(jnp.bfloat16)            # halves im2col HBM bytes
    if pd or ph or pw:
        x_cl = jnp.pad(x_cl, ((0, 0), (pd, pd), (ph, ph), (pw, pw), (0, 0)))
    Nb, D, H, W, C = x_cl.shape
    Do = (D - kd) // sd + 1
    Ho = (H - kh) // sh + 1
    Wo = (W - kw) // sw + 1
    M = Nb * Do * Ho * Wo

    if (kd, kh, kw) == (D, H, W):
        # Kernel spans the whole (padded) volume: one patch per sample.
        col = x_cl.reshape(Nb, D * H * W * C)
    else:
        # TODO(synk): the im2col matrix is still materialized in HBM (bf16); a
        # fully in-kernel gather over kernel offsets would remove the blow-up.
        patches = []
        for dz in range(kd):
            for dy in range(kh):
                for dx in range(kw):
                    patches.append(
                        x_cl[:, dz: dz + (Do - 1) * sd + 1: sd,
                                dy: dy + (Ho - 1) * sh + 1: sh,
                                dx: dx + (Wo - 1) * sw + 1: sw, :])
        col = jnp.stack(patches, axis=4).reshape(M, kd * kh * kw * C)

    out = matmul_bias_act(col, wmat, bias_p, act=act,
                          dual_sigmoid=dual_sigmoid)
    if dual_sigmoid:
        y, p = out
        return (y[:, :cout].reshape(Nb, Do, Ho, Wo, cout),
                p[:, :cout].reshape(Nb, Do, Ho, Wo, cout))
    return out[:, :cout].reshape(Nb, Do, Ho, Wo, cout)


def conv_transpose3d_cl(x_cl, lp, act="none", dual_sigmoid=False):
    """Phase-decomposed ConvTranspose3d (padding fixed at 0, matching the
    reference decoder path), channel-last.  lp is a prepared layer dict."""
    Nb, D, H, W, C = x_cl.shape
    kd, kh, kw = lp["kernel"]
    sd, sh, sw = lp["stride"]
    opd, oph, opw = lp["out_pad"]
    cout = lp["cout"]
    Do = (D - 1) * sd + kd + opd
    Ho = (H - 1) * sh + kh + oph
    Wo = (W - 1) * sw + kw + opw

    # Positions not reached by any phase (output_padding region) are bias-only.
    base = jnp.broadcast_to(lp["bias"].reshape(1, 1, 1, 1, cout),
                            (Nb, Do, Ho, Wo, cout)).astype(jnp.float32)
    if act == "relu":
        base = jnp.maximum(base, 0.0)
    y = base
    p = jax.nn.sigmoid(base) if dual_sigmoid else None

    for (rz, ry, rx, tsz, wmat, bp) in lp["phases"]:
        Tz, Ty, Tx = tsz
        res = conv3d_cl(x_cl, wmat, bp, cout, (Tz, Ty, Tx), (1, 1, 1),
                        (Tz - 1, Ty - 1, Tx - 1), act=act,
                        dual_sigmoid=dual_sigmoid)
        ph_y, ph_p = res if dual_sigmoid else (res, None)
        Qz, Qy, Qx = ph_y.shape[1:4]
        sl = (slice(None),
              slice(rz, rz + sd * Qz, sd),
              slice(ry, ry + sh * Qy, sh),
              slice(rx, rx + sw * Qx, sw),
              slice(None))
        y = y.at[sl].set(ph_y)
        if dual_sigmoid:
            p = p.at[sl].set(ph_p)
    return (y, p) if dual_sigmoid else y


# ----------------------------------------------------------------------------
# Parameter preparation (all weight relayouts done once here, not per call).
# ----------------------------------------------------------------------------
def prep_conv_weight(w, b):
    """Conv3d weight (Cout, Cin, kd, kh, kw) -> lane-dense bf16 matmul weight
    (K, Np) with K ordered (dz, dy, dx, cin), Np = round_up(Cout, 128);
    bias zero-padded to Np (f32)."""
    cout = w.shape[0]
    K = w.shape[1] * w.shape[2] * w.shape[3] * w.shape[4]
    Np = _round_up(cout, LANE)
    wmat = jnp.transpose(w, (2, 3, 4, 1, 0)).reshape(K, cout)
    wmat = jnp.pad(wmat, ((0, 0), (0, Np - cout))).astype(jnp.bfloat16)
    bp = jnp.pad(b.astype(jnp.float32), (0, Np - cout))
    return wmat, bp


def prep_convT_phases(w, b, stride):
    """Decompose a ConvTranspose3d weight (Cin, Cout, kd, kh, kw) into one
    stride-1 conv weight per output phase (flip/transpose/pad done here)."""
    sd, sh, sw = stride
    phases = []
    for rz in range(sd):
        for ry in range(sh):
            for rx in range(sw):
                w_sub = w[:, :, rz::sd, ry::sh, rx::sw]    # (Cin,Cout,Tz,Ty,Tx)
                if 0 in w_sub.shape:
                    continue                               # stride > kernel
                w_conv = jnp.transpose(jnp.flip(w_sub, axis=(2, 3, 4)),
                                       (1, 0, 2, 3, 4))    # (Cout,Cin,Tz,Ty,Tx)
                wmat, bp = prep_conv_weight(w_conv, b)
                phases.append((rz, ry, rx, tuple(w_sub.shape[2:]), wmat, bp))
    return phases


def get_result_dim(img_dim, kernel_size, stride, padding):
    return math.floor((img_dim - kernel_size + 2 * padding) / stride + 1)


def build_conv3d_vae(key, x_dim, z_dim, channels, layers, latent_dim):
    params = {"encoder": [], "decoder": []}
    cur_c, cur_x, cur_z = channels, x_dim, z_dim
    keys = jax.random.split(key, 2 * len(layers) + 4)
    ki = 0

    # encoder: Conv3d(in, out, kernel=(kz,kx,kx), stride=(sz,sx,sx)) + ReLU
    for m in layers:
        cin, cout, kx, kz, sx, sz, pad, _ = m
        fan = cin * kz * kx * kx
        bound = 1.0 / math.sqrt(fan)
        w = jax.random.uniform(keys[ki], (cout, cin, kz, kx, kx),
                               jnp.float32, -bound, bound)
        b = jax.random.uniform(keys[ki + 1], (cout,), jnp.float32,
                               -bound, bound)
        ki += 2
        wmat, bp = prep_conv_weight(w, b)
        params["encoder"].append(dict(wmat=wmat, bias=bp, cout=cout,
                                      kernel=(kz, kx, kx),
                                      stride=(sz, sx, sx), pad=tuple(pad)))
        cur_c = cout
        cur_x = get_result_dim(cur_x, kx, sx, pad[1])
        cur_z = get_result_dim(cur_z, kz, sz, pad[0])

    # mu / logvar: Conv3d over the full remaining volume -> one fused matmul
    fan = cur_c * cur_z * cur_x * cur_x
    bound = 1.0 / math.sqrt(fan)
    kmu, klv, ktr, ktrb = jax.random.split(keys[ki], 4)
    K = fan
    w_mu = jax.random.uniform(kmu, (latent_dim, cur_c, cur_z, cur_x, cur_x),
                              jnp.float32, -bound, bound)
    b_mu = jax.random.uniform(jax.random.fold_in(kmu, 1), (latent_dim,),
                              jnp.float32, -bound, bound)
    w_lv = jax.random.uniform(klv, (latent_dim, cur_c, cur_z, cur_x, cur_x),
                              jnp.float32, -bound, bound)
    b_lv = jax.random.uniform(jax.random.fold_in(klv, 1), (latent_dim,),
                              jnp.float32, -bound, bound)
    wm = jnp.concatenate(
        [jnp.transpose(w_mu, (2, 3, 4, 1, 0)).reshape(K, latent_dim),
         jnp.transpose(w_lv, (2, 3, 4, 1, 0)).reshape(K, latent_dim)], axis=1)
    bc = jnp.concatenate([b_mu, b_lv])
    Np = _round_up(2 * latent_dim, LANE)
    params["mu_logvar"] = dict(
        wmat=jnp.pad(wm, ((0, 0), (0, Np - 2 * latent_dim))).astype(jnp.bfloat16),
        bias=jnp.pad(bc.astype(jnp.float32), (0, Np - 2 * latent_dim)))

    # transition: ConvTranspose3d(latent -> cur_c) over a 1x1x1 input == dense
    w_tr = jax.random.uniform(ktr, (latent_dim, cur_c, cur_z, cur_x, cur_x),
                              jnp.float32, -bound, bound)
    b_tr = jax.random.uniform(ktrb, (cur_c,), jnp.float32, -bound, bound)
    kvol = cur_z * cur_x * cur_x
    wm_tr = jnp.transpose(w_tr, (0, 2, 3, 4, 1)).reshape(latent_dim,
                                                         kvol * cur_c)
    b_full = jnp.tile(b_tr, kvol)
    Np = _round_up(kvol * cur_c, LANE)
    params["trans"] = dict(
        wmat=jnp.pad(wm_tr, ((0, 0), (0, Np - kvol * cur_c))).astype(jnp.bfloat16),
        bias=jnp.pad(b_full.astype(jnp.float32), (0, Np - kvol * cur_c)),
        cout=cur_c, kernel=(cur_z, cur_x, cur_x))

    # decoder: reversed layers, phase-decomposed ConvTranspose3d.  padding is
    # always 0 on the decode path, exactly like the reference module.
    rev = list(reversed(layers))
    dkeys = jax.random.split(jax.random.fold_in(key, 7), len(rev))
    for i, m in enumerate(rev):
        c_out_dec, c_in_dec = m[0], m[1]
        kx, kz, sx, sz, opad = m[2], m[3], m[4], m[5], m[7]
        fan_d = c_out_dec * kz * kx * kx
        bound_d = 1.0 / math.sqrt(fan_d)
        # torch ConvTranspose3d weight layout: (Cin, Cout, kd, kh, kw)
        w = jax.random.uniform(dkeys[i], (c_in_dec, c_out_dec, kz, kx, kx),
                               jnp.float32, -bound_d, bound_d)
        b = jax.random.uniform(jax.random.fold_in(dkeys[i], 1), (c_out_dec,),
                               jnp.float32, -bound_d, bound_d)
        params["decoder"].append(dict(
            phases=prep_convT_phases(w, b, (sz, sx, sx)),
            bias=b.astype(jnp.float32), cout=c_out_dec,
            kernel=(kz, kx, kx), stride=(sz, sx, sx), out_pad=tuple(opad)))

    config = dict(channels=channels, x_dim=x_dim, z_dim=z_dim,
                  latent_dim=latent_dim)
    return params, config


# ----------------------------------------------------------------------------
# Forward pass (matches Conv3dVAE.forward: returns y, probs, mu, logvar).
# ----------------------------------------------------------------------------
def conv3d_vae_forward(params, config, x, eps):
    # NCDHW -> channel-last (N, D, H, W, C) for lane-dense kernels.
    h = jnp.transpose(x, (0, 2, 3, 4, 1))
    for lp in params["encoder"]:
        h = conv3d_cl(h, lp["wmat"], lp["bias"], lp["cout"],
                      lp["kernel"], lp["stride"], lp["pad"], act="relu")

    Nb = h.shape[0]
    L = config["latent_dim"]

    # mu / logvar: kernel spans the whole encoded volume -> one fused matmul.
    ml = params["mu_logvar"]
    stats = matmul_bias_act(h.reshape(Nb, -1), ml["wmat"], ml["bias"])
    mu2, logvar2 = stats[:, :L], stats[:, L:2 * L]

    # TODO(synk): torch.randn_like is stateful; eps comes from a fixed JAX key.
    z2 = reparameterize_pallas(mu2, logvar2, eps)

    # transition ConvTranspose3d over the 1x1x1 latent == dense matmul.
    tr = params["trans"]
    kd, kh, kw = tr["kernel"]
    zt = matmul_bias_act(z2, tr["wmat"], tr["bias"])
    y = zt[:, :kd * kh * kw * tr["cout"]].reshape(Nb, kd, kh, kw, tr["cout"])

    probs = None
    dec = params["decoder"]
    for i, lp in enumerate(dec):
        if i < len(dec) - 1:
            y = conv_transpose3d_cl(y, lp, act="relu")
        else:
            # last layer: sigmoid fused into the matmul epilogue (dual output)
            y, probs = conv_transpose3d_cl(y, lp, act="none",
                                           dual_sigmoid=True)

    # crop in channel-last, then back to NCDHW
    cz, cx, cc = config["z_dim"], config["x_dim"], config["channels"]
    y = y[:, :cz, :cx, :cx, :cc]
    probs = probs[:, :cz, :cx, :cx, :cc]
    y = jnp.transpose(y, (0, 4, 1, 2, 3))
    probs = jnp.transpose(probs, (0, 4, 1, 2, 3))
    mu = mu2.reshape(Nb, L, 1, 1, 1)
    logvar = logvar2.reshape(Nb, L, 1, 1, 1)
    return y, probs, mu, logvar


# ----------------------------------------------------------------------------
if __name__ == "__main__":
    # small config: N=2, channels=4, z_dim=8, x_dim=16, latent_dim=32
    batch, channels, z_dim, x_dim, latent_dim = 2, 4, 8, 16, 32
    # layer format: (in_c, out_c, kernel_x, kernel_z, stride_x, stride_z,
    #                padding, output_padding)
    layers = [
        [4, 8, 4, 2, 2, 2, (0, 0, 0), (0, 0, 0)],
        [8, 16, 4, 2, 2, 2, (0, 0, 0), (0, 0, 0)],
    ]

    key = jax.random.PRNGKey(0)
    kx_, keps, kparams = jax.random.split(key, 3)

    params, config = build_conv3d_vae(kparams, x_dim, z_dim, channels,
                                      layers, latent_dim)

    x = jax.random.uniform(kx_, (batch, channels, z_dim, x_dim, x_dim),
                           jnp.float32)
    eps = jax.random.normal(keps, (batch, latent_dim), jnp.float32)

    fwd = jax.jit(functools.partial(conv3d_vae_forward, params, config))
    y, probs, mu, logvar = fwd(x, eps)
    jax.block_until_ready((y, probs, mu, logvar))

    assert mu.shape == (batch, latent_dim, 1, 1, 1)
    assert logvar.shape == (batch, latent_dim, 1, 1, 1)
    assert y.shape == probs.shape
    assert bool(jnp.all(jnp.isfinite(y)))
    assert bool(jnp.all(probs >= 0.0)) and bool(jnp.all(probs <= 1.0))
    print("KERNEL_OK")
</pallas_src>

<mosaic_0001>
module attributes {stable_mosaic.version = 11 : i64} {
  func.func @_mm_kernel(%arg0: i32, %arg1: i32, %arg2: memref<208x128xbf16, #tpu.memory_space<vmem>>, %arg3: memref<128x128xbf16, #tpu.memory_space<vmem>>, %arg4: memref<1x128xf32, #tpu.memory_space<vmem>>, %arg5: memref<208x128xf32, #tpu.memory_space<vmem>>) attributes {dimension_semantics = [#tpu.dimension_semantics<parallel>, #tpu.dimension_semantics<arbitrary>], iteration_bounds = array<i64: 2, 1>, scalar_prefetch = 0 : i64, scratch_operands = 0 : i64, tpu.core_type = #tpu.core_type<tc>, window_params = [{transform_indices = @transform_0, window_bounds = array<i64: 208, 128>}, {transform_indices = @transform_1, window_bounds = array<i64: 128, 128>}, {pipeline_mode = #tpu.pipeline_mode<synchronous>, transform_indices = @transform_2, window_bounds = array<i64: 1, 128>}, {transform_indices = @transform_3, window_bounds = array<i64: 208, 128>}]} {
    %c0 = arith.constant 0 : index
    %c0_0 = arith.constant 0 : index
    %0 = vector.load %arg2[%c0, %c0_0] : memref<208x128xbf16, #tpu.memory_space<vmem>>, vector<208x128xbf16>
    %c0_1 = arith.constant 0 : index
    %c0_2 = arith.constant 0 : index
    %1 = vector.load %arg3[%c0_1, %c0_2] : memref<128x128xbf16, #tpu.memory_space<vmem>>, vector<128x128xbf16>
    %cst = arith.constant dense<0.000000e+00> : vector<208x128xf32>
    %2 = tpu.matmul %0, %1, %cst {dimension_numbers = #tpu.dot_dimension_numbers<[1], [0], [0], [1], [0, 0, 1, 1], [], []>} : vector<208x128xbf16>, vector<128x128xbf16>, vector<208x128xf32> -> vector<208x128xf32>
    %c0_3 = arith.constant 0 : index
    %c0_4 = arith.constant 0 : index
    %3 = vector.load %arg4[%c0_3, %c0_4] : memref<1x128xf32, #tpu.memory_space<vmem>>, vector<1x128xf32>
    %4 = vector.broadcast %3 : vector<1x128xf32> to vector<208x128xf32>
    %5 = arith.addf %2, %4 : vector<208x128xf32>
    %cst_5 = arith.constant 0.000000e+00 : f32
    %6 = vector.broadcast %cst_5 : f32 to vector<208x128xf32>
    %7 = arith.maximumf %5, %6 : vector<208x128xf32>
    %c0_6 = arith.constant 0 : index
    %c0_7 = arith.constant 0 : index
    %8 = vector.load %arg5[%c0_6, %c0_7] : memref<208x128xf32, #tpu.memory_space<vmem>>, vector<208x128xf32>
    tpu.vector_store %arg5[%c0_6, %c0_7], %7 {strides = array<i32>} : memref<208x128xf32, #tpu.memory_space<vmem>>, vector<208x128xf32>,
    return
  }
  func.func @transform_0(%arg0: i32, %arg1: i32) -> (i32, i32) {
    %c0_i32 = arith.constant 0 : i32
    return %arg0, %arg1 : i32, i32
  }
  func.func @transform_1(%arg0: i32, %arg1: i32) -> (i32, i32) {
    %c0_i32 = arith.constant 0 : i32
    %c0_i32_0 = arith.constant 0 : i32
    return %arg1, %c0_i32 : i32, i32
  }
  func.func @transform_2(%arg0: i32, %arg1: i32) -> (i32, i32) {
    %c0_i32 = arith.constant 0 : i32
    %c0_i32_0 = arith.constant 0 : i32
    %c0_i32_1 = arith.constant 0 : i32
    return %c0_i32, %c0_i32_0 : i32, i32
  }
  func.func @transform_3(%arg0: i32, %arg1: i32) -> (i32, i32) {
    %c0_i32 = arith.constant 0 : i32
    %c0_i32_0 = arith.constant 0 : i32
    return %arg0, %c0_i32 : i32, i32
  }
}

module attributes {stable_mosaic.version = 11 : i64} {
  func.func @_mm_kernel(%arg0: i32, %arg1: i32, %arg2: memref<16x256xbf16, #tpu.memory_space<vmem>>, %arg3: memref<256x128xbf16, #tpu.memory_space<vmem>>, %arg4: memref<1x128xf32, #tpu.memory_space<vmem>>, %arg5: memref<16x128xf32, #tpu.memory_space<vmem>>) attributes {dimension_semantics = [#tpu.dimension_semantics<parallel>, #tpu.dimension_semantics<arbitrary>], iteration_bounds = array<i64: 1, 1>, scalar_prefetch = 0 : i64, scratch_operands = 0 : i64, tpu.core_type = #tpu.core_type<tc>, window_params = [{transform_indices = @transform_0, window_bounds = array<i64: 16, 256>}, {transform_indices = @transform_1, window_bounds = array<i64: 256, 128>}, {pipeline_mode = #tpu.pipeline_mode<synchronous>, transform_indices = @transform_2, window_bounds = array<i64: 1, 128>}, {transform_indices = @transform_3, window_bounds = array<i64: 16, 128>}]} {
    %c0 = arith.constant 0 : index
    %c0_0 = arith.constant 0 : index
    %0 = vector.load %arg2[%c0, %c0_0] : memref<16x256xbf16, #tpu.memory_space<vmem>>, vector<16x256xbf16>
    %c0_1 = arith.constant 0 : index
    %c0_2 = arith.constant 0 : index
    %1 = vector.load %arg3[%c0_1, %c0_2] : memref<256x128xbf16, #tpu.memory_space<vmem>>, vector<256x128xbf16>
    %cst = arith.constant dense<0.000000e+00> : vector<16x128xf32>
    %2 = tpu.matmul %0, %1, %cst {dimension_numbers = #tpu.dot_dimension_numbers<[1], [0], [0], [1], [0, 0, 1, 1], [], []>} : vector<16x256xbf16>, vector<256x128xbf16>, vector<16x128xf32> -> vector<16x128xf32>
    %c0_3 = arith.constant 0 : index
    %c0_4 = arith.constant 0 : index
    %3 = vector.load %arg4[%c0_3, %c0_4] : memref<1x128xf32, #tpu.memory_space<vmem>>, vector<1x128xf32>
    %4 = vector.broadcast %3 : vector<1x128xf32> to vector<16x128xf32>
    %5 = arith.addf %2, %4 : vector<16x128xf32>
    %cst_5 = arith.constant 0.000000e+00 : f32
    %6 = vector.broadcast %cst_5 : f32 to vector<16x128xf32>
    %7 = arith.maximumf %5, %6 : vector<16x128xf32>
    %c0_6 = arith.constant 0 : index
    %c0_7 = arith.constant 0 : index
    %8 = vector.load %arg5[%c0_6, %c0_7] : memref<16x128xf32, #tpu.memory_space<vmem>>, vector<16x128xf32>
    tpu.vector_store %arg5[%c0_6, %c0_7], %7 {strides = array<i32>} : memref<16x128xf32, #tpu.memory_space<vmem>>, vector<16x128xf32>,
    return
  }
  func.func @transform_0(%arg0: i32, %arg1: i32) -> (i32, i32) {
    %c0_i32 = arith.constant 0 : i32
    return %arg0, %arg1 : i32, i32
  }
  func.func @transform_1(%arg0: i32, %arg1: i32) -> (i32, i32) {
    %c0_i32 = arith.constant 0 : i32
    %c0_i32_0 = arith.constant 0 : i32
    return %arg1, %c0_i32 : i32, i32
  }
  func.func @transform_2(%arg0: i32, %arg1: i32) -> (i32, i32) {
    %c0_i32 = arith.constant 0 : i32
    %c0_i32_0 = arith.constant 0 : i32
    %c0_i32_1 = arith.constant 0 : i32
    return %c0_i32, %c0_i32_0 : i32, i32
  }
  func.func @transform_3(%arg0: i32, %arg1: i32) -> (i32, i32) {
    %c0_i32 = arith.constant 0 : i32
    %c0_i32_0 = arith.constant 0 : i32
    return %arg0, %c0_i32 : i32, i32
  }
}

module attributes {stable_mosaic.version = 11 : i64} {
  func.func @_reparam_kernel(%arg0: memref<2x32xf32, #tpu.memory_space<vmem>>, %arg1: memref<2x32xf32, #tpu.memory_space<vmem>>, %arg2: memref<2x32xf32, #tpu.memory_space<vmem>>, %arg3: memref<2x32xf32, #tpu.memory_space<vmem>>) attributes {dimension_semantics = [], scalar_prefetch = 0 : i64, scratch_operands = 0 : i64, tpu.core_type = #tpu.core_type<tc>} {
    %c0 = arith.constant 0 : index
    %c0_0 = arith.constant 0 : index
    %0 = vector.load %arg0[%c0, %c0_0] : memref<2x32xf32, #tpu.memory_space<vmem>>, vector<2x32xf32>
    %c0_1 = arith.constant 0 : index
    %c0_2 = arith.constant 0 : index
    %1 = vector.load %arg2[%c0_1, %c0_2] : memref<2x32xf32, #tpu.memory_space<vmem>>, vector<2x32xf32>
    %c0_3 = arith.constant 0 : index
    %c0_4 = arith.constant 0 : index
    %2 = vector.load %arg1[%c0_3, %c0_4] : memref<2x32xf32, #tpu.memory_space<vmem>>, vector<2x32xf32>
    %cst = arith.constant 5.000000e-01 : f32
    %3 = vector.broadcast %cst : f32 to vector<2x32xf32>
    %4 = arith.mulf %3, %2 : vector<2x32xf32>
    %5 = math.exp %4 : vector<2x32xf32>
    %6 = arith.mulf %1, %5 : vector<2x32xf32>
    %7 = arith.addf %0, %6 : vector<2x32xf32>
    %c0_5 = arith.constant 0 : index
    %c0_6 = arith.constant 0 : index
    %8 = vector.load %arg3[%c0_5, %c0_6] : memref<2x32xf32, #tpu.memory_space<vmem>>, vector<2x32xf32>
    tpu.vector_store %arg3[%c0_5, %c0_6], %7 {strides = array<i32>} : memref<2x32xf32, #tpu.memory_space<vmem>>, vector<2x32xf32>,
    return
  }
}

module attributes {stable_mosaic.version = 11 : i64} {
  func.func @_mm_kernel(%arg0: i32, %arg1: i32, %arg2: memref<2x128xbf16, #tpu.memory_space<vmem>>, %arg3: memref<128x128xbf16, #tpu.memory_space<vmem>>, %arg4: memref<1x128xf32, #tpu.memory_space<vmem>>, %arg5: memref<2x128xf32, #tpu.memory_space<vmem>>) attributes {dimension_semantics = [#tpu.dimension_semantics<parallel>, #tpu.dimension_semantics<arbitrary>], iteration_bounds = array<i64: 1, 1>, scalar_prefetch = 0 : i64, scratch_operands = 0 : i64, tpu.core_type = #tpu.core_type<tc>, window_params = [{transform_indices = @transform_0, window_bounds = array<i64: 2, 128>}, {transform_indices = @transform_1, window_bounds = array<i64: 128, 128>}, {pipeline_mode = #tpu.pipeline_mode<synchronous>, transform_indices = @transform_2, window_bounds = array<i64: 1, 128>}, {transform_indices = @transform_3, window_bounds = array<i64: 2, 128>}]} {
    %c0 = arith.constant 0 : index
    %c0_0 = arith.constant 0 : index
    %0 = vector.load %arg2[%c0, %c0_0] : memref<2x128xbf16, #tpu.memory_space<vmem>>, vector<2x128xbf16>
    %c0_1 = arith.constant 0 : index
    %c0_2 = arith.constant 0 : index
    %1 = vector.load %arg3[%c0_1, %c0_2] : memref<128x128xbf16, #tpu.memory_space<vmem>>, vector<128x128xbf16>
    %cst = arith.constant dense<0.000000e+00> : vector<2x128xf32>
    %2 = tpu.matmul %0, %1, %cst {dimension_numbers = #tpu.dot_dimension_numbers<[1], [0], [0], [1], [0, 0, 1, 1], [], []>} : vector<2x128xbf16>, vector<128x128xbf16>, vector<2x128xf32> -> vector<2x128xf32>
    %c0_3 = arith.constant 0 : index
    %c0_4 = arith.constant 0 : index
    %3 = vector.load %arg4[%c0_3, %c0_4] : memref<1x128xf32, #tpu.memory_space<vmem>>, vector<1x128xf32>
    %4 = vector.broadcast %3 : vector<1x128xf32> to vector<2x128xf32>
    %5 = arith.addf %2, %4 : vector<2x128xf32>
    %c0_5 = arith.constant 0 : index
    %c0_6 = arith.constant 0 : index
    %6 = vector.load %arg5[%c0_5, %c0_6] : memref<2x128xf32, #tpu.memory_space<vmem>>, vector<2x128xf32>
    tpu.vector_store %arg5[%c0_5, %c0_6], %5 {strides = array<i32>} : memref<2x128xf32, #tpu.memory_space<vmem>>, vector<2x128xf32>,
    return
  }
  func.func @transform_0(%arg0: i32, %arg1: i32) -> (i32, i32) {
    %c0_i32 = arith.constant 0 : i32
    return %arg0, %arg1 : i32, i32
  }
  func.func @transform_1(%arg0: i32, %arg1: i32) -> (i32, i32) {
    %c0_i32 = arith.constant 0 : i32
    %c0_i32_0 = arith.constant 0 : i32
    return %arg1, %c0_i32 : i32, i32
  }
  func.func @transform_2(%arg0: i32, %arg1: i32) -> (i32, i32) {
    %c0_i32 = arith.constant 0 : i32
    %c0_i32_0 = arith.constant 0 : i32
    %c0_i32_1 = arith.constant 0 : i32
    return %c0_i32, %c0_i32_0 : i32, i32
  }
  func.func @transform_3(%arg0: i32, %arg1: i32) -> (i32, i32) {
    %c0_i32 = arith.constant 0 : i32
    %c0_i32_0 = arith.constant 0 : i32
    return %arg0, %c0_i32 : i32, i32
  }
}

module attributes {stable_mosaic.version = 11 : i64} {
  func.func @_mm_kernel(%arg0: i32, %arg1: i32, %arg2: memref<2x32xbf16, #tpu.memory_space<vmem>>, %arg3: memref<32x128xbf16, #tpu.memory_space<vmem>>, %arg4: memref<1x128xf32, #tpu.memory_space<vmem>>, %arg5: memref<2x128xf32, #tpu.memory_space<vmem>>) attributes {dimension_semantics = [#tpu.dimension_semantics<parallel>, #tpu.dimension_semantics<arbitrary>], iteration_bounds = array<i64: 1, 1>, scalar_prefetch = 0 : i64, scratch_operands = 0 : i64, tpu.core_type = #tpu.core_type<tc>, window_params = [{transform_indices = @transform_0, window_bounds = array<i64: 2, 32>}, {transform_indices = @transform_1, window_bounds = array<i64: 32, 128>}, {pipeline_mode = #tpu.pipeline_mode<synchronous>, transform_indices = @transform_2, window_bounds = array<i64: 1, 128>}, {transform_indices = @transform_3, window_bounds = array<i64: 2, 128>}]} {
    %c0 = arith.constant 0 : index
    %c0_0 = arith.constant 0 : index
    %0 = vector.load %arg2[%c0, %c0_0] : memref<2x32xbf16, #tpu.memory_space<vmem>>, vector<2x32xbf16>
    %c0_1 = arith.constant 0 : index
    %c0_2 = arith.constant 0 : index
    %1 = vector.load %arg3[%c0_1, %c0_2] : memref<32x128xbf16, #tpu.memory_space<vmem>>, vector<32x128xbf16>
    %cst = arith.constant dense<0.000000e+00> : vector<2x128xf32>
    %2 = tpu.matmul %0, %1, %cst {dimension_numbers = #tpu.dot_dimension_numbers<[1], [0], [0], [1], [0, 0, 1, 1], [], []>} : vector<2x32xbf16>, vector<32x128xbf16>, vector<2x128xf32> -> vector<2x128xf32>
    %c0_3 = arith.constant 0 : index
    %c0_4 = arith.constant 0 : index
    %3 = vector.load %arg4[%c0_3, %c0_4] : memref<1x128xf32, #tpu.memory_space<vmem>>, vector<1x128xf32>
    %4 = vector.broadcast %3 : vector<1x128xf32> to vector<2x128xf32>
    %5 = arith.addf %2, %4 : vector<2x128xf32>
    %c0_5 = arith.constant 0 : index
    %c0_6 = arith.constant 0 : index
    %6 = vector.load %arg5[%c0_5, %c0_6] : memref<2x128xf32, #tpu.memory_space<vmem>>, vector<2x128xf32>
    tpu.vector_store %arg5[%c0_5, %c0_6], %5 {strides = array<i32>} : memref<2x128xf32, #tpu.memory_space<vmem>>, vector<2x128xf32>,
    return
  }
  func.func @transform_0(%arg0: i32, %arg1: i32) -> (i32, i32) {
    %c0_i32 = arith.constant 0 : i32
    return %arg0, %arg1 : i32, i32
  }
  func.func @transform_1(%arg0: i32, %arg1: i32) -> (i32, i32) {
    %c0_i32 = arith.constant 0 : i32
    %c0_i32_0 = arith.constant 0 : i32
    return %arg1, %c0_i32 : i32, i32
  }
  func.func @transform_2(%arg0: i32, %arg1: i32) -> (i32, i32) {
    %c0_i32 = arith.constant 0 : i32
    %c0_i32_0 = arith.constant 0 : i32
    %c0_i32_1 = arith.constant 0 : i32
    return %c0_i32, %c0_i32_0 : i32, i32
  }
  func.func @transform_3(%arg0: i32, %arg1: i32) -> (i32, i32) {
    %c0_i32 = arith.constant 0 : i32
    %c0_i32_0 = arith.constant 0 : i32
    return %arg0, %c0_i32 : i32, i32
  }
}

module attributes {stable_mosaic.version = 11 : i64} {
  func.func @_mm_kernel(%arg0: i32, %arg1: i32, %arg2: memref<36x64xbf16, #tpu.memory_space<vmem>>, %arg3: memref<64x128xbf16, #tpu.memory_space<vmem>>, %arg4: memref<1x128xf32, #tpu.memory_space<vmem>>, %arg5: memref<36x128xf32, #tpu.memory_space<vmem>>) attributes {dimension_semantics = [#tpu.dimension_semantics<parallel>, #tpu.dimension_semantics<arbitrary>], iteration_bounds = array<i64: 1, 1>, scalar_prefetch = 0 : i64, scratch_operands = 0 : i64, tpu.core_type = #tpu.core_type<tc>, window_params = [{transform_indices = @transform_0, window_bounds = array<i64: 36, 64>}, {transform_indices = @transform_1, window_bounds = array<i64: 64, 128>}, {pipeline_mode = #tpu.pipeline_mode<synchronous>, transform_indices = @transform_2, window_bounds = array<i64: 1, 128>}, {transform_indices = @transform_3, window_bounds = array<i64: 36, 128>}]} {
    %c0 = arith.constant 0 : index
    %c0_0 = arith.constant 0 : index
    %0 = vector.load %arg2[%c0, %c0_0] : memref<36x64xbf16, #tpu.memory_space<vmem>>, vector<36x64xbf16>
    %c0_1 = arith.constant 0 : index
    %c0_2 = arith.constant 0 : index
    %1 = vector.load %arg3[%c0_1, %c0_2] : memref<64x128xbf16, #tpu.memory_space<vmem>>, vector<64x128xbf16>
    %cst = arith.constant dense<0.000000e+00> : vector<36x128xf32>
    %2 = tpu.matmul %0, %1, %cst {dimension_numbers = #tpu.dot_dimension_numbers<[1], [0], [0], [1], [0, 0, 1, 1], [], []>} : vector<36x64xbf16>, vector<64x128xbf16>, vector<36x128xf32> -> vector<36x128xf32>
    %c0_3 = arith.constant 0 : index
    %c0_4 = arith.constant 0 : index
    %3 = vector.load %arg4[%c0_3, %c0_4] : memref<1x128xf32, #tpu.memory_space<vmem>>, vector<1x128xf32>
    %4 = vector.broadcast %3 : vector<1x128xf32> to vector<36x128xf32>
    %5 = arith.addf %2, %4 : vector<36x128xf32>
    %cst_5 = arith.constant 0.000000e+00 : f32
    %6 = vector.broadcast %cst_5 : f32 to vector<36x128xf32>
    %7 = arith.maximumf %5, %6 : vector<36x128xf32>
    %c0_6 = arith.constant 0 : index
    %c0_7 = arith.constant 0 : index
    %8 = vector.load %arg5[%c0_6, %c0_7] : memref<36x128xf32, #tpu.memory_space<vmem>>, vector<36x128xf32>
    tpu.vector_store %arg5[%c0_6, %c0_7], %7 {strides = array<i32>} : memref<36x128xf32, #tpu.memory_space<vmem>>, vector<36x128xf32>,
    return
  }
  func.func @transform_0(%arg0: i32, %arg1: i32) -> (i32, i32) {
    %c0_i32 = arith.constant 0 : i32
    return %arg0, %arg1 : i32, i32
  }
  func.func @transform_1(%arg0: i32, %arg1: i32) -> (i32, i32) {
    %c0_i32 = arith.constant 0 : i32
    %c0_i32_0 = arith.constant 0 : i32
    return %arg1, %c0_i32 : i32, i32
  }
  func.func @transform_2(%arg0: i32, %arg1: i32) -> (i32, i32) {
    %c0_i32 = arith.constant 0 : i32
    %c0_i32_0 = arith.constant 0 : i32
    %c0_i32_1 = arith.constant 0 : i32
    return %c0_i32, %c0_i32_0 : i32, i32
  }
  func.func @transform_3(%arg0: i32, %arg1: i32) -> (i32, i32) {
    %c0_i32 = arith.constant 0 : i32
    %c0_i32_0 = arith.constant 0 : i32
    return %arg0, %c0_i32 : i32, i32
  }
}

module attributes {stable_mosaic.version = 11 : i64} {
  func.func @_mm_kernel(%arg0: i32, %arg1: i32, %arg2: memref<208x32xbf16, #tpu.memory_space<vmem>>, %arg3: memref<32x128xbf16, #tpu.memory_space<vmem>>, %arg4: memref<1x128xf32, #tpu.memory_space<vmem>>, %arg5: memref<208x128xf32, #tpu.memory_space<vmem>>, %arg6: memref<208x128xf32, #tpu.memory_space<vmem>>) attributes {dimension_semantics = [#tpu.dimension_semantics<parallel>, #tpu.dimension_semantics<arbitrary>], iteration_bounds = array<i64: 2, 1>, scalar_prefetch = 0 : i64, scratch_operands = 0 : i64, tpu.core_type = #tpu.core_type<tc>, window_params = [{transform_indices = @transform_0, window_bounds = array<i64: 208, 32>}, {transform_indices = @transform_1, window_bounds = array<i64: 32, 128>}, {pipeline_mode = #tpu.pipeline_mode<synchronous>, transform_indices = @transform_2, window_bounds = array<i64: 1, 128>}, {transform_indices = @transform_3, window_bounds = array<i64: 208, 128>}, {transform_indices = @transform_4, window_bounds = array<i64: 208, 128>}]} {
    %c0 = arith.constant 0 : index
    %c0_0 = arith.constant 0 : index
    %0 = vector.load %arg2[%c0, %c0_0] : memref<208x32xbf16, #tpu.memory_space<vmem>>, vector<208x32xbf16>
    %c0_1 = arith.constant 0 : index
    %c0_2 = arith.constant 0 : index
    %1 = vector.load %arg3[%c0_1, %c0_2] : memref<32x128xbf16, #tpu.memory_space<vmem>>, vector<32x128xbf16>
    %cst = arith.constant dense<0.000000e+00> : vector<208x128xf32>
    %2 = tpu.matmul %0, %1, %cst {dimension_numbers = #tpu.dot_dimension_numbers<[1], [0], [0], [1], [0, 0, 1, 1], [], []>} : vector<208x32xbf16>, vector<32x128xbf16>, vector<208x128xf32> -> vector<208x128xf32>
    %c0_3 = arith.constant 0 : index
    %c0_4 = arith.constant 0 : index
    %3 = vector.load %arg4[%c0_3, %c0_4] : memref<1x128xf32, #tpu.memory_space<vmem>>, vector<1x128xf32>
    %4 = vector.broadcast %3 : vector<1x128xf32> to vector<208x128xf32>
    %5 = arith.addf %2, %4 : vector<208x128xf32>
    %c0_5 = arith.constant 0 : index
    %c0_6 = arith.constant 0 : index
    %6 = vector.load %arg5[%c0_5, %c0_6] : memref<208x128xf32, #tpu.memory_space<vmem>>, vector<208x128xf32>
    tpu.vector_store %arg5[%c0_5, %c0_6], %5 {strides = array<i32>} : memref<208x128xf32, #tpu.memory_space<vmem>>, vector<208x128xf32>,
    %7 = arith.negf %5 : vector<208x128xf32>
    %8 = math.exp %7 : vector<208x128xf32>
    %cst_7 = arith.constant 1.000000e+00 : f32
    %9 = vector.broadcast %cst_7 : f32 to vector<208x128xf32>
    %10 = arith.addf %9, %8 : vector<208x128xf32>
    %11 = arith.divf %9, %10 : vector<208x128xf32>
    %c0_8 = arith.constant 0 : index
    %c0_9 = arith.constant 0 : index
    %12 = vector.load %arg6[%c0_8, %c0_9] : memref<208x128xf32, #tpu.memory_space<vmem>>, vector<208x128xf32>
    tpu.vector_store %arg6[%c0_8, %c0_9], %11 {strides = array<i32>} : memref<208x128xf32, #tpu.memory_space<vmem>>, vector<208x128xf32>,
    return
  }
  func.func @transform_0(%arg0: i32, %arg1: i32) -> (i32, i32) {
    %c0_i32 = arith.constant 0 : i32
    return %arg0, %arg1 : i32, i32
  }
  func.func @transform_1(%arg0: i32, %arg1: i32) -> (i32, i32) {
    %c0_i32 = arith.constant 0 : i32
    %c0_i32_0 = arith.constant 0 : i32
    return %arg1, %c0_i32 : i32, i32
  }
  func.func @transform_2(%arg0: i32, %arg1: i32) -> (i32, i32) {
    %c0_i32 = arith.constant 0 : i32
    %c0_i32_0 = arith.constant 0 : i32
    %c0_i32_1 = arith.constant 0 : i32
    return %c0_i32, %c0_i32_0 : i32, i32
  }
  func.func @transform_3(%arg0: i32, %arg1: i32) -> (i32, i32) {
    %c0_i32 = arith.constant 0 : i32
    %c0_i32_0 = arith.constant 0 : i32
    return %arg0, %c0_i32 : i32, i32
  }
  func.func @transform_4(%arg0: i32, %arg1: i32) -> (i32, i32) {
    %c0_i32 = arith.constant 0 : i32
    %c0_i32_0 = arith.constant 0 : i32
    return %arg0, %c0_i32 : i32, i32
  }
}

</mosaic_0001>

<bundles_post_ra>
// kernel: conv3d_vae_forward.21
= control target key start
LH: loop header
LB: loop body
LE: loop exit
PB: predicated region body
PF: predicated region fallthrough
CT: control target
= control target key end

     0   :  { %s1265_s12 = smov 0   ;;  %s1267_s13 = smov 0   ;;  %s1549_s0 = inlined_call_operand.vmem [shape: bf16[392,128], index: 0, kind: input, shape index: {}]   ;;  %s1550_s1 = inlined_call_operand.vmem [shape: bf16[128,128], index: 1, kind: input, shape index: {}]   ;;  %s1551_s2 = inlined_call_operand.vmem [shape: f32[1,128], index: 2, kind: input, shape index: {}]   ;;  %s1552_s3 = inlined_call_operand.vmem [shape: f32[392,128], index: 3, kind: output, shape index: {}]  }
   0x1   :  { %s1269_s14 = smov 0   ;;  %s1271_s15 = smov 0  }
   0x2   :  { %s1273_s16 = smov 0  }
   0x3 LB: > { %s879_s17 = sadd.s32 4294967295, %s1211_s16   ;;  %s25_s18 = sadd.s32 1, %s1207_s15  ;;  %s1211_s16 = sphi %s1273_s16, %s13_s16   ;;  %s1207_s15 = sphi %s1271_s15, %s1562_s15   ;;  %s1203_s14 = sphi %s1269_s14, %s1561_s14   ;;  %s1199_s13 = sphi %s1267_s13, %s1560_s13   ;;  %s1195_s12 = sphi %s1265_s12, %s1559_s12  }
   0x4   : > { %p27_p0 = scmp.ge.s32.totalorder %s25_s18, 2  ;;  %s107_s19 = sadd.s32 1, %s1199_s13 }
   0x5   : > { %p117_p1 = scmp.ne.s32.totalorder %s1199_s13, %s1195_s12  ;;  %p118_p2 = scmp.eq.s32.totalorder %s879_s17, 1 }
   0x6   : > { %s1564_s18 = smov (%p27_p0, %s25_s18), 0  ;;  %p884_p4 = scmp.ge.s32.totalorder %s1211_s16, 1 }
   0x7   : > { %p1297_p3 = por %p118_p2, %p117_p1  ;;  %s104_s21 = ssub.s32 %s1207_s15, %s1564_s18 }
   0x8   : > { %p174_p5 = scmp.lt.s32.totalorder %s1211_s16, 3  ;;  %p105_p6 = scmp.eq.s32.totalorder %s104_s21, 0 }
   0xa   : > { %p175_p7 = pnand %p884_p4, %p174_p5 }
   0xb   : > { %s1306_s22 = scalar_select %p105_p6, %s1199_s13, %s107_s19  }
   0xc   : > { %178 = sbr.rel (%p175_p7) target bundleno = 315 (0x13b), region = 32  ;;  %s206_s26 = sand.u32 (!%p175_p7), 1, %s1195_s12  }
   0xd   : > { %s1321_s4 = smul.u32 (!%p175_p7), 26, %s1203_s14 }
   0xe   : > { %s1028_s29 = smul.u32 (!%p175_p7), 208, %s206_s26 }
   0xf   : > { %p214_p8 = scmp.lt.s32.totalorder (!%p175_p7), %s1321_s4, 48 }
  0x10   : > { %s1363_s30 = scalar_lea.vmem (!%p175_p7), [#allocation2], %s1028_s29  }
  0x11   : > { %v1002_v0 = vld [vmem:[%s1550_s1 + $0x38] sm:$0xff]  ;;  %v1001_v1 = vld [vmem:[%s1550_s1 + $0x30] sm:$0xff]  ;;  %v1000_v2 = vld [vmem:[%s1550_s1 + $0x28] sm:$0xff]  ;;  %s215_s9 = scalar_select %p214_p8, %s1321_s4, 48 }
  0x12   : > { %1005 = vmatpush.bf16.msra.mxu2 %v1002_v0  ;;  %1006 = vmatpush.bf16.msra.mxu3 %v1002_v0  ;;  %v999_v3 = vld [vmem:[%s1550_s1 + $0x20] sm:$0xff]  ;;  %v998_v4 = vld [vmem:[%s1550_s1 + $0x18] sm:$0xff]  ;;  %v997_v5 = vld [vmem:[%s1550_s1 + $0x10] sm:$0xff]  ;;  %s543_s12 = ssub.s32 (%p1297_p3), 49, %s1321_s4  ;;  %s1003_s5 = smul.u32 (%p1297_p3), 208, %s1203_s14 }
  0x13   : > { %409 = vmatpush.bf16.msra.mxu0 %v1002_v0  ;;  %1004 = vmatpush.bf16.msra.mxu1 %v1002_v0  ;;  %v996_v6 = vld [vmem:[%s1550_s1 + $0x8] sm:$0xff]  ;;  %s885_s17 = sshll.u32 %s215_s9, 2  ;;  %v995_v7 = vld [vmem:[%s1550_s1] sm:$0xff]  ;;  %p544_p9 = scmp.lt.s32.totalorder (%p1297_p3), %s543_s12, 26 }
  0x14   : > { %s1340_s25 = scalar_lea.vmem %s1549_s0, %s885_s17  ;;  %v1359_v21 = vld [vmem:[%s1551_s2] ss:$0 sm:$0xff]  ;;  %s1422_s8 = scalar_lea.vmem (%p1297_p3), %s1552_s3, %s1003_s5  }
  0x15   : > { %v988_v8 = vld [vmem:[%s1340_s25 + $0x30] sm:$0xff]  ;;  %v982_v10 = vld [vmem:[%s1340_s25] sm:$0xff]  ;;  %v985_v11 = vld [vmem:[%s1340_s25 + $0x18] sm:$0xff] }
  0x16   : > { %1008 = vmatpush.bf16.msra.mxu2 %v1001_v1  ;;  %1009 = vmatpush.bf16.msra.mxu3 %v1001_v1  ;;  %v992_v9 = vld [vmem:[%s1340_s25 + $0x50] sm:$0xff]  ;;  %v989_v12 = vld [vmem:[%s1340_s25 + $0x38] sm:$0xff]  ;;  %v983_v14 = vld [vmem:[%s1340_s25 + $0x8] sm:$0xff] }
  0x17   : > { %410 = vmatpush.bf16.msra.mxu0 %v1001_v1  ;;  %1007 = vmatpush.bf16.msra.mxu1 %v1001_v1  ;;  %v993_v13 = vld [vmem:[%s1340_s25 + $0x58] sm:$0xff]  ;;  %v986_v15 = vld [vmem:[%s1340_s25 + $0x20] sm:$0xff]  ;;  %v984_v18 = vld [vmem:[%s1340_s25 + $0x10] sm:$0xff] }
  0x18   : > { %v990_v16 = vld [vmem:[%s1340_s25 + $0x40] sm:$0xff]  ;;  %v987_v19 = vld [vmem:[%s1340_s25 + $0x28] sm:$0xff] }
  0x19   : > { %v994_v17 = vld [vmem:[%s1340_s25 + $0x60] sm:$0xff]  ;;  %v991_v20 = vld [vmem:[%s1340_s25 + $0x48] sm:$0xff] }
  0x1a   : > { %1011 = vmatpush.bf16.msra.mxu2 %v1000_v2  ;;  %1012 = vmatpush.bf16.msra.mxu3 %v1000_v2 }
  0x1b   : > { %411 = vmatpush.bf16.msra.mxu0 %v1000_v2  ;;  %1010 = vmatpush.bf16.msra.mxu1 %v1000_v2 }
  0x1e   : > { %1014 = vmatpush.bf16.msra.mxu2 %v999_v3  ;;  %1015 = vmatpush.bf16.msra.mxu3 %v999_v3 }
  0x1f   : > { %412 = vmatpush.bf16.msra.mxu0 %v999_v3  ;;  %1013 = vmatpush.bf16.msra.mxu1 %v999_v3 }
  0x22   : > { %1017 = vmatpush.bf16.msra.mxu2 %v998_v4  ;;  %1018 = vmatpush.bf16.msra.mxu3 %v998_v4 }
  0x23   : > { %413 = vmatpush.bf16.msra.mxu0 %v998_v4  ;;  %1016 = vmatpush.bf16.msra.mxu1 %v998_v4 }
  0x26   : > { %1020 = vmatpush.bf16.msra.mxu2 %v997_v5  ;;  %1021 = vmatpush.bf16.msra.mxu3 %v997_v5 }
  0x27   : > { %414 = vmatpush.bf16.msra.mxu0 %v997_v5  ;;  %1019 = vmatpush.bf16.msra.mxu1 %v997_v5 }
  0x2a   : > { %1023 = vmatpush.bf16.msra.mxu2 %v996_v6  ;;  %1024 = vmatpush.bf16.msra.mxu3 %v996_v6 }
  0x2b   : > { %415 = vmatpush.bf16.msra.mxu0 %v996_v6  ;;  %1022 = vmatpush.bf16.msra.mxu1 %v996_v6 }
  0x2e   : > { %1026 = vmatpush.bf16.msra.mxu2 %v995_v7  ;;  %1027 = vmatpush.bf16.msra.mxu3 %v995_v7 }
  0x2f   : > { %416 = vmatpush.bf16.msra.mxu0 %v995_v7  ;;  %1025 = vmatpush.bf16.msra.mxu1 %v995_v7 }
  0x31   : > { %447 = vmatmul.bf16.vlgmr.msra.gmra.mxu2 %v988_v8  ;;  %467 = vmatmul.bf16.vlgmr.msra.gmra.mxu3 %v992_v9 }
  0x32   : > { %417 = vmatmul.bf16.vlgmr.msra.gmra.mxu0 %v982_v10  ;;  %432 = vmatmul.bf16.vlgmr.msra.gmra.mxu1 %v985_v11 }
  0x41   : > { %452 = vmatmul.bf16.gmra.mxu2 %v989_v12  ;;  %472 = vmatmul.bf16.gmra.mxu3 %v993_v13 }
  0x42   : > { %422 = vmatmul.bf16.gmra.mxu0 %v983_v14  ;;  %437 = vmatmul.bf16.gmra.mxu1 %v986_v15 }
  0x51   : > { %457 = vmatmul.bf16.gmra.mxu2 %v990_v16  ;;  %477 = vmatmul.bf16.gmra.mxu3 %v994_v17 }
  0x52   : > { %427 = vmatmul.bf16.gmra.mxu0 %v984_v18  ;;  %442 = vmatmul.bf16.gmra.mxu1 %v987_v19 }
  0x61   : > { %462 = vmatmul.bf16.gmra.mxu2 %v991_v20 }
  0xaf   : > { %v418_v22 = vpop.f32.mrf.mxu0  ;;  %v433_v23 = vpop.f32.mrf.mxu1 }
  0xb0   : > { %v419_v24 = vadd.f32 %v1359_v21, %v418_v22  ;;  %v434_v25 = vadd.f32 %v1359_v21, %v433_v23 }
  0xb2   : > { %v483_v26 = vmax.f32 %v419_v24, 0.0  ;;  %v489_v27 = vmax.f32 %v434_v25, 0.0 }
  0xb4   : > { %v448_v28 = vpop.f32.mrf.mxu2  ;;  %509 = vst [vmem:[%s1363_s30] sm:$0xff] %v483_v26  ;;  %v468_v29 = vpop.f32.mrf.mxu3 }
  0xb5   : > { %v449_v30 = vadd.f32 %v1359_v21, %v448_v28  ;;  %515 = vst [vmem:[%s1363_s30 + $0x30] sm:$0xff] %v489_v27  ;;  %v469_v31 = vadd.f32 %v1359_v21, %v468_v29 }
  0xb7   : > { %v495_v32 = vmax.f32 %v449_v30, 0.0  ;;  %v503_v33 = vmax.f32 %v469_v31, 0.0  ;;  %v420_v34 = vpop.f32.mrf.mxu0  ;;  %v435_v35 = vpop.f32.mrf.mxu1 }
  0xb8   : > { %v421_v36 = vadd.f32 %v1359_v21, %v420_v34  ;;  %v436_v37 = vadd.f32 %v1359_v21, %v435_v35 }
  0xb9   : > { %521 = vst [vmem:[%s1363_s30 + $0x60] sm:$0xff] %v495_v32 }
  0xba   : > { %529 = vst [vmem:[%s1363_s30 + $0xa0] sm:$0xff] %v503_v33  ;;  %v484_v38 = vmax.f32 %v421_v36, 0.0  ;;  %v490_v39 = vmax.f32 %v436_v37, 0.0 }
  0xbc   : > { %v450_v40 = vpop.f32.mrf.mxu2  ;;  %510 = vst [vmem:[%s1363_s30 + $0x8] sm:$0xff] %v484_v38  ;;  %v470_v41 = vpop.f32.mrf.mxu3 }
  0xbd   : > { %v451_v42 = vadd.f32 %v1359_v21, %v450_v40  ;;  %516 = vst [vmem:[%s1363_s30 + $0x38] sm:$0xff] %v490_v39  ;;  %v471_v43 = vadd.f32 %v1359_v21, %v470_v41 }
  0xbf   : > { %v496_v44 = vmax.f32 %v451_v42, 0.0  ;;  %v504_v45 = vmax.f32 %v471_v43, 0.0  ;;  %v423_v46 = vpop.f32.mrf.mxu0  ;;  %v438_v47 = vpop.f32.mrf.mxu1 }
  0xc0   : > { %v424_v48 = vadd.f32 %v1359_v21, %v423_v46  ;;  %v439_v49 = vadd.f32 %v1359_v21, %v438_v47 }
  0xc1   : > { %522 = vst [vmem:[%s1363_s30 + $0x68] sm:$0xff] %v496_v44 }
  0xc2   : > { %530 = vst [vmem:[%s1363_s30 + $0xa8] sm:$0xff] %v504_v45  ;;  %v485_v50 = vmax.f32 %v424_v48, 0.0  ;;  %v491_v51 = vmax.f32 %v439_v49, 0.0 }
  0xc4   : > { %v453_v52 = vpop.f32.mrf.mxu2  ;;  %511 = vst [vmem:[%s1363_s30 + $0x10] sm:$0xff] %v485_v50  ;;  %v473_v53 = vpop.f32.mrf.mxu3 }
  0xc5   : > { %v454_v54 = vadd.f32 %v1359_v21, %v453_v52  ;;  %517 = vst [vmem:[%s1363_s30 + $0x40] sm:$0xff] %v491_v51  ;;  %v474_v55 = vadd.f32 %v1359_v21, %v473_v53 }
  0xc7   : > { %v497_v56 = vmax.f32 %v454_v54, 0.0  ;;  %v505_v57 = vmax.f32 %v474_v55, 0.0  ;;  %v425_v58 = vpop.f32.mrf.mxu0  ;;  %v440_v59 = vpop.f32.mrf.mxu1 }
  0xc8   : > { %v426_v60 = vadd.f32 %v1359_v21, %v425_v58  ;;  %v441_v61 = vadd.f32 %v1359_v21, %v440_v59 }
  0xc9   : > { %523 = vst [vmem:[%s1363_s30 + $0x70] sm:$0xff] %v497_v56 }
  0xca   : > { %531 = vst [vmem:[%s1363_s30 + $0xb0] sm:$0xff] %v505_v57  ;;  %v486_v62 = vmax.f32 %v426_v60, 0.0  ;;  %v492_v63 = vmax.f32 %v441_v61, 0.0 }
  0xcc   : > { %v455_v0 = vpop.f32.mrf.mxu2  ;;  %512 = vst [vmem:[%s1363_s30 + $0x18] sm:$0xff] %v486_v62  ;;  %v475_v1 = vpop.f32.mrf.mxu3 }
  0xcd   : > { %v456_v2 = vadd.f32 %v1359_v21, %v455_v0  ;;  %518 = vst [vmem:[%s1363_s30 + $0x48] sm:$0xff] %v492_v63  ;;  %v476_v3 = vadd.f32 %v1359_v21, %v475_v1 }
  0xcf   : > { %v498_v4 = vmax.f32 %v456_v2, 0.0  ;;  %v506_v5 = vmax.f32 %v476_v3, 0.0  ;;  %v428_v6 = vpop.f32.mrf.mxu0  ;;  %v443_v7 = vpop.f32.mrf.mxu1 }
  0xd0   : > { %v429_v8 = vadd.f32 %v1359_v21, %v428_v6  ;;  %v444_v9 = vadd.f32 %v1359_v21, %v443_v7 }
  0xd1   : > { %524 = vst [vmem:[%s1363_s30 + $0x78] sm:$0xff] %v498_v4 }
  0xd2   : > { %532 = vst [vmem:[%s1363_s30 + $0xb8] sm:$0xff] %v506_v5  ;;  %v487_v10 = vmax.f32 %v429_v8, 0.0  ;;  %v493_v11 = vmax.f32 %v444_v9, 0.0 }
  0xd4   : > { %v458_v12 = vpop.f32.mrf.mxu2  ;;  %513 = vst [vmem:[%s1363_s30 + $0x20] sm:$0xff] %v487_v10  ;;  %v478_v13 = vpop.f32.mrf.mxu3 }
  0xd5   : > { %v459_v14 = vadd.f32 %v1359_v21, %v458_v12  ;;  %519 = vst [vmem:[%s1363_s30 + $0x50] sm:$0xff] %v493_v11  ;;  %v479_v15 = vadd.f32 %v1359_v21, %v478_v13 }
  0xd7   : > { %v499_v16 = vmax.f32 %v459_v14, 0.0  ;;  %v507_v17 = vmax.f32 %v479_v15, 0.0  ;;  %v430_v18 = vpop.f32.mrf.mxu0  ;;  %v445_v19 = vpop.f32.mrf.mxu1 }
  0xd8   : > { %v431_v20 = vadd.f32 %v1359_v21, %v430_v18  ;;  %v446_v22 = vadd.f32 %v1359_v21, %v445_v19 }
  0xd9   : > { %525 = vst [vmem:[%s1363_s30 + $0x80] sm:$0xff] %v499_v16 }
  0xda   : > { %533 = vst [vmem:[%s1363_s30 + $0xc0] sm:$0xff] %v507_v17  ;;  %v488_v23 = vmax.f32 %v431_v20, 0.0  ;;  %v494_v24 = vmax.f32 %v446_v22, 0.0 }
  0xdc   : > { %v460_v25 = vpop.f32.mrf.mxu2  ;;  %514 = vst [vmem:[%s1363_s30 + $0x28] sm:$0xff] %v488_v23  ;;  %v480_v26 = vpop.f32.mrf.mxu3 }
  0xdd   : > { %v461_v27 = vadd.f32 %v1359_v21, %v460_v25  ;;  %520 = vst [vmem:[%s1363_s30 + $0x58] sm:$0xff] %v494_v24  ;;  %v481_v28 = vadd.f32 %v1359_v21, %v480_v26 }
  0xdf   : > { %v500_v29 = vmax.f32 %v461_v27, 0.0  ;;  %v508_v30 = vmax.f32 %v481_v28, 0.0 }
  0xe1   : > { %526 = vst [vmem:[%s1363_s30 + $0x88] sm:$0xff] %v500_v29 }
  0xe2   : > { %534 = vst [vmem:[%s1363_s30 + $0xc8] sm:$0xff] %v508_v30 }
  0xe4   : > { %v463_v31 = vpop.f32.mrf.mxu2 }
  0xe5   : > { %v464_v32 = vadd.f32 %v1359_v21, %v463_v31 }
  0xe7   : > { %v501_v33 = vmax.f32 %v464_v32, 0.0 }
  0xe9   : > { %527 = vst [vmem:[%s1363_s30 + $0x90] sm:$0xff] %v501_v33 }
  0xec   : > { %v465_v34 = vpop.f32.mrf.mxu2 }
  0xed   : > { %v466_v35 = vadd.f32 %v1359_v21, %v465_v34  ;;  %541 = sbr.rel (!%p1297_p3) target bundleno = 315 (0x13b), region = 36 }
  0xef   : > { %v502_v36 = vmax.f32 %v466_v35, 0.0 }
  0xf1   : > { %528 = vst [vmem:[%s1363_s30 + $0x98] sm:$0xff] %v502_v36 }
  0xf2   : > { %s1566_s12 = smov (!%p544_p9, %s543_s12), 26 }
  0xf3   : > { %s970_s9 = sshll.u32 %s1566_s12, 3 }
  0xf4   : > { %p973_p10 = scmp.eq.s32.totalorder %s970_s9, 0 }
  0xf5   : > { %1135 = sdivrem.u32 (!%p973_p10), %s1566_s12, 26 }
  0xf6   : > { %552 = sbr.rel (%p973_p10) target bundleno = 315 (0x13b), region = 40 }
  0xfe   : > { %s1428_s20 = spop.drf %1135 }
  0xff   : > { %s1137_s10 = spop.drf %1135  ;;  %p974_p11 = scmp.le.s32.totalorder %s1428_s20, 0 }
 0x100   : > { %s1554_s14 = smov (!%p974_p11), %s1422_s8  ;;  %s1555_s4 = smov (!%p974_p11), %s1363_s30 }
 0x101   : > { %818 = sbr.rel (%p974_p11) target bundleno = 289 (0x121), region = 119  ;;  %s1437_s11 = smov (!%p974_p11), 0  }
 0x102   : > { %s1439_s17 = smov (!%p974_p11), 0  }
 0x106 LB: >> { %v667_v21 = vld [vmem:[%s1219_s4] sm:$0xff]  ;;  %v669_v37 = vld [vmem:[%s1219_s4 + $0x8] sm:$0xff]  ;;  %v671_v38 = vld [vmem:[%s1219_s4 + $0x10] sm:$0xff]  ;;  %s719_s19 = sadd.s32 1, %s1223_s11  ;;  %s661_s17 = sadd.s32 1, %s1227_s17   ;;  %s1227_s17 = sphi %s1439_s17, %s661_s17   ;;  %s1223_s11 = sphi %s1437_s11, %s1558_s11   ;;  %s1219_s4 = sphi %s1555_s4, %s1557_s4   ;;  %s1215_s14 = sphi %s1554_s14, %s1556_s14  }
 0x107   : >> { %668 = vst [vmem:[%s1215_s14] sm:$0xff] %v667_v21  ;;  %v673_v39 = vld [vmem:[%s1219_s4 + $0x18] sm:$0xff]  ;;  %p720_p12 = scmp.ge.s32.totalorder %s719_s19, %s1428_s20  ;;  %v675_v40 = vld [vmem:[%s1219_s4 + $0x20] sm:$0xff]  ;;  %v677_v41 = vld [vmem:[%s1219_s4 + $0x28] sm:$0xff]  ;;  %p660_p13 = scmp.ge.s32.totalorder %s661_s17, %s1428_s20 }
 0x108   : >> { %670 = vst [vmem:[%s1215_s14 + $0x8] sm:$0xff] %v669_v37  ;;  %v679_v42 = vld [vmem:[%s1219_s4 + $0x30] sm:$0xff]  ;;  %v681_v43 = vld [vmem:[%s1219_s4 + $0x38] sm:$0xff]  ;;  %v683_v44 = vld [vmem:[%s1219_s4 + $0x40] sm:$0xff] }
 0x109   : >> { %672 = vst [vmem:[%s1215_s14 + $0x10] sm:$0xff] %v671_v38  ;;  %s1568_s19 = smov (%p720_p12, %s719_s19), 0  ;;  %v685_v45 = vld [vmem:[%s1219_s4 + $0x48] sm:$0xff]  ;;  %v687_v46 = vld [vmem:[%s1219_s4 + $0x50] sm:$0xff]  ;;  %v689_v47 = vld [vmem:[%s1219_s4 + $0x58] sm:$0xff] }
 0x10a   : >> { %674 = vst [vmem:[%s1215_s14 + $0x18] sm:$0xff] %v673_v39  ;;  %s722_s21 = smul.u32 208, %s1568_s19  ;;  %v691_v48 = vld [vmem:[%s1219_s4 + $0x60] sm:$0xff]  ;;  %v693_v49 = vld [vmem:[%s1219_s4 + $0x68] sm:$0xff]  ;;  %v695_v50 = vld [vmem:[%s1219_s4 + $0x70] sm:$0xff]  ;;  %s1558_s11 = smov %s1568_s19 }
 0x10b   : >> { %676 = vst [vmem:[%s1215_s14 + $0x20] sm:$0xff] %v675_v40  ;;  %v697_v51 = vld [vmem:[%s1219_s4 + $0x78] sm:$0xff]  ;;  %v699_v52 = vld [vmem:[%s1219_s4 + $0x80] sm:$0xff]  ;;  %v701_v53 = vld [vmem:[%s1219_s4 + $0x88] sm:$0xff] }
 0x10c   : >> { %678 = vst [vmem:[%s1215_s14 + $0x28] sm:$0xff] %v677_v41  ;;  %s1473_s23 = scalar_lea.vmem %s1363_s30, %s722_s21 [#allocation2]   ;;  %s1476_s24 = scalar_lea.vmem %s1422_s8, %s722_s21   ;;  %v703_v54 = vld [vmem:[%s1219_s4 + $0x90] sm:$0xff]  ;;  %v705_v55 = vld [vmem:[%s1219_s4 + $0x98] sm:$0xff]  ;;  %v707_v56 = vld [vmem:[%s1219_s4 + $0xa0] sm:$0xff] }
 0x10d   : >> { %680 = vst [vmem:[%s1215_s14 + $0x30] sm:$0xff] %v679_v42  ;;  %v709_v57 = vld [vmem:[%s1219_s4 + $0xa8] sm:$0xff]  ;;  %v711_v58 = vld [vmem:[%s1219_s4 + $0xb0] sm:$0xff]  ;;  %v713_v59 = vld [vmem:[%s1219_s4 + $0xb8] sm:$0xff] }
 0x10e   : >> { %682 = vst [vmem:[%s1215_s14 + $0x38] sm:$0xff] %v681_v43  ;;  %v715_v60 = vld [vmem:[%s1219_s4 + $0xc0] sm:$0xff]  ;;  %v717_v61 = vld [vmem:[%s1219_s4 + $0xc8] sm:$0xff]  ;;  %s1557_s4 = smov %s1473_s23 }
 0x10f   : >> { %684 = vst [vmem:[%s1215_s14 + $0x40] sm:$0xff] %v683_v44 }
 0x110   : >> { %686 = vst [vmem:[%s1215_s14 + $0x48] sm:$0xff] %v685_v45 }
 0x111   : >> { %688 = vst [vmem:[%s1215_s14 + $0x50] sm:$0xff] %v687_v46 }
 0x112   : >> { %690 = vst [vmem:[%s1215_s14 + $0x58] sm:$0xff] %v689_v47 }
 0x113   : >> { %692 = vst [vmem:[%s1215_s14 + $0x60] sm:$0xff] %v691_v48 }
 0x114   : >> { %694 = vst [vmem:[%s1215_s14 + $0x68] sm:$0xff] %v693_v49 }
 0x115   : >> { %696 = vst [vmem:[%s1215_s14 + $0x70] sm:$0xff] %v695_v50 }
 0x116   : >> { %698 = vst [vmem:[%s1215_s14 + $0x78] sm:$0xff] %v697_v51 }
 0x117   : >> { %700 = vst [vmem:[%s1215_s14 + $0x80] sm:$0xff] %v699_v52 }
 0x118   : >> { %702 = vst [vmem:[%s1215_s14 + $0x88] sm:$0xff] %v701_v53 }
 0x119   : >> { %704 = vst [vmem:[%s1215_s14 + $0x90] sm:$0xff] %v703_v54 }
 0x11a   : >> { %706 = vst [vmem:[%s1215_s14 + $0x98] sm:$0xff] %v705_v55 }
 0x11b   : >> { %708 = vst [vmem:[%s1215_s14 + $0xa0] sm:$0xff] %v707_v56 }
 0x11c   : >> { %710 = vst [vmem:[%s1215_s14 + $0xa8] sm:$0xff] %v709_v57  ;;  %663 = sbr.rel (!%p660_p13) target bundleno = 262 (0x106), region = 125 }
 0x11d   : >> { %712 = vst [vmem:[%s1215_s14 + $0xb0] sm:$0xff] %v711_v58 }
 0x11e   : >> { %714 = vst [vmem:[%s1215_s14 + $0xb8] sm:$0xff] %v713_v59 }
 0x11f   : >> { %716 = vst [vmem:[%s1215_s14 + $0xc0] sm:$0xff] %v715_v60 }
 0x120   : >> { %718 = vst [vmem:[%s1215_s14 + $0xc8] sm:$0xff] %v717_v61  ;;  %s1556_s14 = smov %s1476_s24 }
 0x121 PF: > { %1138 = sdivrem.u32 %s1566_s12, 26 }
 0x122   : > { %s975_s25 = smul.u32 208, %s1428_s20 }
 0x124   : > { %s1529_s26 = scalar_lea.vmem %s1363_s30, %s975_s25 [#allocation2]   ;;  %s732_s27 = scalar_lea.vmem %s1422_s8, %s975_s25  }
 0x12a   : > { %s1139_s28 = spop.drf %1138 }
 0x12b   : > { %s1140_s29 = spop.drf %1138 }
 0x12c   : > { %p977_p0 = scmp.le.s32.totalorder %s1140_s29, 0 }
 0x12d   : > { %s1229_s5 = smov (!%p977_p0), %s732_s27   ;;  %s1233_s6 = smov (!%p977_p0), %s1529_s26  }
 0x12e   : > { %832 = sbr.rel (%p977_p0) target bundleno = 315 (0x13b), region = 130  ;;  %s1237_s7 = smov (!%p977_p0), 0  }
 0x12f   : > { %s1241_s9 = smov (!%p977_p0), 0  }
 0x133 LB: >> { %v742_v62 = vld [vmem:[%s1235_s6] sm:$0xff]  ;;  %s744_s30 = sadd.s32 1, %s1239_s7  ;;  %s736_s9 = sadd.s32 1, %s1243_s9   ;;  %s1243_s9 = sphi %s1241_s9, %s736_s9   ;;  %s1239_s7 = sphi %s1237_s7, %s1238_s7   ;;  %s1235_s6 = sphi %s1233_s6, %s749_s6   ;;  %s1231_s5 = sphi %s1229_s5, %s750_s5  }
 0x134   : >> { %743 = vst [vmem:[%s1231_s5] sm:$0xff] %v742_v62  ;;  %p745_p1 = scmp.ge.s32.totalorder %s744_s30, %s1140_s29  ;;  %p735_p2 = scmp.ge.s32.totalorder %s736_s9, %s1140_s29 }
 0x136   : >> { %s1570_s30 = smov (%p745_p1, %s744_s30), 0  ;;  %738 = sbr.rel (!%p735_p2) target bundleno = 307 (0x133), region = 136 }
 0x137   : >> { %s978_s12 = sshll.u32 %s1570_s30, 3  ;;  %s1238_s7 = smov %s1570_s30  }
 0x138   : >> { %s749_s6 = scalar_lea.vmem %s1529_s26, %s978_s12 [#allocation2]   ;;  %s750_s5 = scalar_lea.vmem %s732_s27, %s978_s12  }
 0x13b PF: > { %s13_s16 = sadd.s32 1, %s1211_s16   ;;  %s1559_s12 = smov %s1199_s13 }
 0x13c   : > { %p10_p3 = scmp.ge.s32.totalorder %s13_s16, 4   ;;  %s1560_s13 = smov %s1306_s22 }
 0x13d   : > { %s1561_s14 = smov %s1207_s15  ;;  %s1562_s15 = smov %s1564_s18 }
 0x13e   :  { %12 = sbr.rel (!%p10_p3) target bundleno = 3 (0x3), region = 147 }

// kernel: conv3d_vae_forward.22
= control target key start
LH: loop header
LB: loop body
LE: loop exit
PB: predicated region body
PF: predicated region fallthrough
CT: control target
= control target key end

     0   :  { %s374_s1 = inlined_call_operand.vmem [shape: bf16[256,128], index: 1, kind: input, shape index: {}]   ;;  %s375_s2 = inlined_call_operand.vmem [shape: f32[1,128], index: 2, kind: input, shape index: {}]   ;;  %s376_s0 = inlined_call_operand.vmem [shape: bf16[16,256], index: 0, kind: input, shape index: {}]   ;;  %s377_s3 = inlined_call_operand.vmem [shape: f32[16,128], index: 3, kind: output, shape index: {}]  }
   0x1   :  { %v275_v0 = vld [vmem:[%s374_s1 + $0x38] sm:$0xff]  ;;  %v274_v2 = vld [vmem:[%s374_s1 + $0x30] sm:$0xff]  ;;  %v273_v4 = vld [vmem:[%s374_s1 + $0x28] sm:$0xff] }
   0x2   :  { %v283_v1 = vld [vmem:[%s374_s1 + $0x78] sm:$0xff]  ;;  %158 = vmatpush.bf16.msra.mxu0 %v275_v0  ;;  %v282_v3 = vld [vmem:[%s374_s1 + $0x70] sm:$0xff]  ;;  %v281_v5 = vld [vmem:[%s374_s1 + $0x68] sm:$0xff] }
   0x3   :  { %172 = vmatpush.bf16.msra.mxu1 %v283_v1  ;;  %v272_v6 = vld [vmem:[%s374_s1 + $0x20] sm:$0xff]  ;;  %v271_v8 = vld [vmem:[%s374_s1 + $0x18] sm:$0xff]  ;;  %v270_v10 = vld [vmem:[%s374_s1 + $0x10] sm:$0xff] }
   0x4   :  { %v280_v7 = vld [vmem:[%s374_s1 + $0x60] sm:$0xff]  ;;  %v279_v9 = vld [vmem:[%s374_s1 + $0x58] sm:$0xff]  ;;  %v278_v11 = vld [vmem:[%s374_s1 + $0x50] sm:$0xff] }
   0x5   :  { %v269_v12 = vld [vmem:[%s374_s1 + $0x8] sm:$0xff]  ;;  %v268_v14 = vld [vmem:[%s374_s1] sm:$0xff] }
   0x6   :  { %159 = vmatpush.bf16.msra.mxu0 %v274_v2  ;;  %v277_v13 = vld [vmem:[%s374_s1 + $0x48] sm:$0xff]  ;;  %v276_v15 = vld [vmem:[%s374_s1 + $0x40] sm:$0xff] }
   0x7   :  { %173 = vmatpush.bf16.msra.mxu1 %v282_v3  ;;  %v196_v16 = vld [vmem:[%s376_s0] sm:$0xf]  ;;  %v267_v17 = vld [vmem:[%s376_s0 + $0x4] sm:$0xf0]  ;;  %v266_v18 = vld [vmem:[%s376_s0 + $0x4] sm:$0xf] }
   0x8   :  { %v198_v19 = vld [vmem:[%s376_s0 + $0x8] sm:$0xf0]  ;;  %v197_v20 = vor.u32 %v267_v17, %v196_v16  ;;  %v284_v22 = vld [vmem:[%s375_s2] ss:$0 sm:$0xff] }
   0x9   :  { %v201_v21 = vor.u32 %v266_v18, %v198_v19 }
   0xa   :  { %160 = vmatpush.bf16.msra.mxu0 %v273_v4 }
   0xb   :  { %174 = vmatpush.bf16.msra.mxu1 %v281_v5 }
   0xe   :  { %161 = vmatpush.bf16.msra.mxu0 %v272_v6 }
   0xf   :  { %175 = vmatpush.bf16.msra.mxu1 %v280_v7 }
  0x12   :  { %162 = vmatpush.bf16.msra.mxu0 %v271_v8 }
  0x13   :  { %176 = vmatpush.bf16.msra.mxu1 %v279_v9 }
  0x16   :  { %163 = vmatpush.bf16.msra.mxu0 %v270_v10 }
  0x17   :  { %177 = vmatpush.bf16.msra.mxu1 %v278_v11 }
  0x1a   :  { %164 = vmatpush.bf16.msra.mxu0 %v269_v12 }
  0x1b   :  { %178 = vmatpush.bf16.msra.mxu1 %v277_v13 }
  0x1e   :  { %165 = vmatpush.bf16.msra.mxu0 %v268_v14 }
  0x1f   :  { %179 = vmatpush.bf16.msra.mxu1 %v276_v15 }
  0x21   :  { %166 = vmatmul.bf16.vlgmr.msra.gmra.mxu0 %v197_v20 }
  0x22   :  { %180 = vmatmul.bf16.vlgmr.msra.gmra.mxu1 %v201_v21 }
  0x9e   :  { %v167_v23 = vpop.f32.mrf.mxu0 }
  0x9f   :  { %v181_v24 = vpop.f32.mrf.mxu1  ;;  %v168_v25 = vadd.f32 %v284_v22, %v167_v23 }
  0xa1   :  { %v182_v26 = vadd.f32 %v181_v24, %v168_v25 }
  0xa3   :  { %v186_v27 = vmax.f32 %v182_v26, 0.0 }
  0xa5   :  { %188 = vst [vmem:[%s377_s3] sm:$0xff] %v186_v27 }
  0xa6   :  { %v169_v28 = vpop.f32.mrf.mxu0 }
  0xa7   :  { %v170_v29 = vadd.f32 %v284_v22, %v169_v28  ;;  %v183_v30 = vpop.f32.mrf.mxu1 }
  0xa9   :  { %v184_v31 = vadd.f32 %v183_v30, %v170_v29 }
  0xab   :  { %v187_v32 = vmax.f32 %v184_v31, 0.0 }
  0xad   :  { %189 = vst [vmem:[%s377_s3 + $0x8] sm:$0xff] %v187_v32 }

// kernel: conv3d_vae_forward.24
= control target key start
LH: loop header
LB: loop body
LE: loop exit
PB: predicated region body
PF: predicated region fallthrough
CT: control target
= control target key end

     0   :  { %vm22_vm0 = vcmask 254976   ;;  %s62_s1 = inlined_call_operand.vmem [shape: f32[2,32], index: 1, kind: input, shape index: {}]   ;;  %s63_s2 = inlined_call_operand.vmem [shape: f32[2,32], index: 2, kind: input, shape index: {}]   ;;  %s64_s0 = inlined_call_operand.vmem [shape: f32[2,32], index: 0, kind: input, shape index: {}]   ;;  %s65_s3 = inlined_call_operand.vmem [shape: f32[2,32], index: 3, kind: output, shape index: {}]  }
   0x1   :  { %v16_v0 = vld [vmem:[%s62_s1] sm:$0x3] }
   0x2   :  { %v17_v1 = vmul.f32 0.5, %v16_v0  ;;  %v15_v3 = vld [vmem:[%s63_s2] sm:$0x3] }
   0x3   :  { %v14_v5 = vld [vmem:[%s64_s0] sm:$0x3] }
   0x4   :  { %v18_v2 = vmul.f32 1.442695, %v17_v1 }
   0x6   :  { %28 = vpow2.f32 %v18_v2 }
   0xc   :  { %v29_v4 = vpop.eup %28 }
   0xd   :  { %v20_v6 = vmul.f32 %v29_v4, %v15_v3 }
   0xf   :  { %v21_v7 = vadd.f32 %v20_v6, %v14_v5 }
  0x11   :  { %23 = vst.msk [vmem:[%s65_s3] sm:$0x3] %vm22_vm0, %v21_v7 }

// kernel: conv3d_vae_forward.23
= control target key start
LH: loop header
LB: loop body
LE: loop exit
PB: predicated region body
PF: predicated region fallthrough
CT: control target
= control target key end

     0   :  { %s195_s1 = inlined_call_operand.vmem [shape: bf16[128,128], index: 1, kind: input, shape index: {}]   ;;  %s196_s2 = inlined_call_operand.vmem [shape: f32[1,128], index: 2, kind: input, shape index: {}]   ;;  %s197_s0 = inlined_call_operand.vmem [shape: bf16[2,128], index: 0, kind: input, shape index: {}]   ;;  %s198_s3 = inlined_call_operand.vmem [shape: f32[2,128], index: 3, kind: output, shape index: {}]  }
   0x1   :  { %v140_v0 = vld [vmem:[%s195_s1 + $0x38] sm:$0xff]  ;;  %v139_v1 = vld [vmem:[%s195_s1 + $0x30] sm:$0xff]  ;;  %v138_v2 = vld [vmem:[%s195_s1 + $0x28] sm:$0xff] }
   0x2   :  { %83 = vmatpush.bf16.msra.mxu0 %v140_v0  ;;  %v137_v3 = vld [vmem:[%s195_s1 + $0x20] sm:$0xff]  ;;  %v136_v4 = vld [vmem:[%s195_s1 + $0x18] sm:$0xff]  ;;  %v135_v5 = vld [vmem:[%s195_s1 + $0x10] sm:$0xff] }
   0x3   :  { %v134_v6 = vld [vmem:[%s195_s1 + $0x8] sm:$0xff]  ;;  %v133_v7 = vld [vmem:[%s195_s1] sm:$0xff] }
   0x4   :  { %v14_v8 = vld [vmem:[%s197_s0] sm:$0x1] }
   0x5   :  { %v141_v9 = vld [vmem:[%s196_s2] ss:$0 sm:$0xff] }
   0x6   :  { %84 = vmatpush.bf16.msra.mxu0 %v139_v1 }
   0xa   :  { %85 = vmatpush.bf16.msra.mxu0 %v138_v2 }
   0xe   :  { %86 = vmatpush.bf16.msra.mxu0 %v137_v3 }
  0x12   :  { %87 = vmatpush.bf16.msra.mxu0 %v136_v4 }
  0x16   :  { %88 = vmatpush.bf16.msra.mxu0 %v135_v5 }
  0x1a   :  { %89 = vmatpush.bf16.msra.mxu0 %v134_v6 }
  0x1e   :  { %90 = vmatpush.bf16.msra.mxu0 %v133_v7 }
  0x21   :  { %91 = vmatmul.bf16.vlgmr.msra.gmra.mxu0 %v14_v8 }
  0x9e   :  { %v92_v10 = vpop.f32.mrf.mxu0 }
  0x9f   :  { %v93_v11 = vadd.f32 %v141_v9, %v92_v10 }
  0xa1   :  { %96 = vst [vmem:[%s198_s3] sm:$0x3] %v93_v11 }
  0xa6   :  { %v94_v12 = vpop.f32.mrf.mxu0 }

// kernel: conv3d_vae_forward.25
= control target key start
LH: loop header
LB: loop body
LE: loop exit
PB: predicated region body
PF: predicated region fallthrough
CT: control target
= control target key end

     0   :  { %vm36_vm0 = vcmask 261120   ;;  %s105_s1 = inlined_call_operand.vmem [shape: bf16[32,128], index: 1, kind: input, shape index: {}]   ;;  %s106_s2 = inlined_call_operand.vmem [shape: f32[1,128], index: 2, kind: input, shape index: {}]   ;;  %s107_s0 = inlined_call_operand.vmem [shape: bf16[2,32], index: 0, kind: input, shape index: {}]   ;;  %s108_s3 = inlined_call_operand.vmem [shape: f32[2,128], index: 3, kind: output, shape index: {}]  }
   0x1   :  { %v68_v0 = vld [vmem:[%s105_s1 + $0x8] sm:$0xff]  ;;  %v67_v1 = vld [vmem:[%s105_s1] sm:$0xff] }
   0x2   :  { %46 = vmatpush.bf16.msra.mxu0 %v68_v0  ;;  %v15_v2 = vld [vmem:[%s107_s0] sm:$0x1] }
   0x3   :  { %v69_v3 = vld [vmem:[%s106_s2] ss:$0 sm:$0xff] }
   0x6   :  { %47 = vmatpush.bf16.msra.mxu0 %v67_v1 }
   0x9   :  { %66 = vmatmul.msk.bf16.vlgmr.msra.gmra.mxu0 %vm36_vm0, %v15_v2 }
  0x86   :  { %v49_v4 = vpop.f32.mrf.mxu0 }
  0x87   :  { %v50_v5 = vadd.f32 %v69_v3, %v49_v4 }
  0x89   :  { %53 = vst [vmem:[%s108_s3] sm:$0x3] %v50_v5 }
  0x8e   :  { %v51_v6 = vpop.f32.mrf.mxu0 }

// kernel: conv3d_vae_forward.26
= control target key start
LH: loop header
LB: loop body
LE: loop exit
PB: predicated region body
PF: predicated region fallthrough
CT: control target
= control target key end

     0   :  { %vm69_vm0 = vcmask 523264   ;;  %s217_s1 = inlined_call_operand.vmem [shape: bf16[64,128], index: 1, kind: input, shape index: {}]   ;;  %s218_s2 = inlined_call_operand.vmem [shape: f32[1,128], index: 2, kind: input, shape index: {}]   ;;  %s219_s0 = inlined_call_operand.vmem [shape: bf16[36,64], index: 0, kind: input, shape index: {}]   ;;  %s220_s3 = inlined_call_operand.vmem [shape: f32[36,128], index: 3, kind: output, shape index: {}]  }
   0x1   :  { %v148_v0 = vld [vmem:[%s217_s1 + $0x18] sm:$0xff]  ;;  %v147_v1 = vld [vmem:[%s217_s1 + $0x10] sm:$0xff]  ;;  %v146_v2 = vld [vmem:[%s217_s1 + $0x8] sm:$0xff] }
   0x2   :  { %83 = vmatpush.bf16.msra.mxu0 %v148_v0  ;;  %149 = vmatpush.bf16.msra.mxu1 %v148_v0  ;;  %v19_v3 = vld [vmem:[%s219_s0 + $0x10] sm:$0x3]  ;;  %v145_v4 = vld [vmem:[%s217_s1] sm:$0xff]  ;;  %v144_v7 = vld [vmem:[%s219_s0 + $0x8] sm:$0xff] }
   0x3   :  { %150 = vmatpush.bf16.msra.mxu2 %v148_v0  ;;  %v41_v5 = vunpack.c.l.b16 %v19_v3  ;;  %v143_v6 = vld [vmem:[%s219_s0] sm:$0xff] }
   0x4   :  { %v157_v9 = vld [vmem:[%s218_s2] ss:$0 sm:$0xff] }
   0x5   :  { %v44_v8 = vpack.c.b16 %v41_v5, %v41_v5 }
   0x6   :  { %84 = vmatpush.bf16.msra.mxu0 %v147_v1  ;;  %151 = vmatpush.bf16.msra.mxu1 %v147_v1 }
   0x7   :  { %152 = vmatpush.bf16.msra.mxu2 %v147_v1 }
   0xa   :  { %85 = vmatpush.bf16.msra.mxu0 %v146_v2  ;;  %153 = vmatpush.bf16.msra.mxu1 %v146_v2 }
   0xb   :  { %154 = vmatpush.bf16.msra.mxu2 %v146_v2 }
   0xe   :  { %86 = vmatpush.bf16.msra.mxu0 %v145_v4  ;;  %155 = vmatpush.bf16.msra.mxu1 %v145_v4 }
   0xf   :  { %156 = vmatpush.bf16.msra.mxu2 %v145_v4 }
  0x11   :  { %140 = vmatmul.msk.bf16.vlgmr.msra.gmra.mxu0 %vm69_vm0, %v143_v6  ;;  %141 = vmatmul.msk.bf16.vlgmr.msra.gmra.mxu1 %vm69_vm0, %v144_v7 }
  0x12   :  { %142 = vmatmul.msk.bf16.vlgmr.msra.gmra.mxu2 %vm69_vm0, %v44_v8 }
  0x8e   :  { %v88_v10 = vpop.f32.mrf.mxu0  ;;  %v93_v11 = vpop.f32.mrf.mxu1 }
  0x8f   :  { %v89_v12 = vadd.f32 %v157_v9, %v88_v10  ;;  %v94_v13 = vadd.f32 %v157_v9, %v93_v11 }
  0x91   :  { %v102_v14 = vmax.f32 %v89_v12, 0.0  ;;  %v104_v15 = vmax.f32 %v94_v13, 0.0 }
  0x93   :  { %107 = vst [vmem:[%s220_s3] sm:$0xff] %v102_v14 }
  0x94   :  { %109 = vst [vmem:[%s220_s3 + $0x10] sm:$0xff] %v104_v15 }
  0x95   :  { %v98_v16 = vpop.f32.mrf.mxu2 }
  0x96   :  { %v99_v17 = vadd.f32 %v157_v9, %v98_v16  ;;  %v90_v18 = vpop.f32.mrf.mxu0  ;;  %v95_v19 = vpop.f32.mrf.mxu1 }
  0x97   :  { %v91_v20 = vadd.f32 %v157_v9, %v90_v18  ;;  %v96_v21 = vadd.f32 %v157_v9, %v95_v19 }
  0x98   :  { %v106_v22 = vmax.f32 %v99_v17, 0.0 }
  0x99   :  { %v103_v23 = vmax.f32 %v91_v20, 0.0  ;;  %v105_v24 = vmax.f32 %v96_v21, 0.0 }
  0x9a   :  { %111 = vst [vmem:[%s220_s3 + $0x20] sm:$0xf] %v106_v22 }
  0x9b   :  { %108 = vst [vmem:[%s220_s3 + $0x8] sm:$0xff] %v103_v23 }
  0x9c   :  { %110 = vst [vmem:[%s220_s3 + $0x18] sm:$0xff] %v105_v24 }
  0x9d   :  { %v100_v25 = vpop.f32.mrf.mxu2 }

// kernel: conv3d_vae_forward.34
= control target key start
LH: loop header
LB: loop body
LE: loop exit
PB: predicated region body
PF: predicated region fallthrough
CT: control target
= control target key end

     0   :  { %s2319_s15 = smov 0   ;;  %s2321_s16 = smov 0   ;;  %s3152_s0 = inlined_call_operand.vmem [shape: bf16[392,32], index: 0, kind: input, shape index: {}]   ;;  %s3153_s1 = inlined_call_operand.vmem [shape: bf16[32,128], index: 1, kind: input, shape index: {}]   ;;  %s3154_s2 = inlined_call_operand.vmem [shape: f32[1,128], index: 2, kind: input, shape index: {}]   ;;  %s3155_s3 = inlined_call_operand.vmem [shape: f32[392,128], index: 3, kind: output, shape index: {0}]   ;;  %s3156_s4 = inlined_call_operand.vmem [shape: f32[392,128], index: 4, kind: output, shape index: {1}]  }
   0x1   :  { %s2323_s17 = smov 0   ;;  %s2325_s18 = smov 0  }
   0x2   :  { %s2327_s19 = smov 0  }
   0x3 LB: > { %s1687_s20 = sadd.s32 4294967295, %s2228_s19   ;;  %s27_s21 = sadd.s32 1, %s2224_s18  ;;  %s2228_s19 = sphi %s2327_s19, %s15_s19   ;;  %s2224_s18 = sphi %s2325_s18, %s3231_s18   ;;  %s2220_s17 = sphi %s2323_s17, %s3230_s17   ;;  %s2216_s16 = sphi %s2321_s16, %s3229_s16   ;;  %s2212_s15 = sphi %s2319_s15, %s3228_s15  }
   0x4   : > { %p29_p0 = scmp.ge.s32.totalorder %s27_s21, 2  ;;  %s109_s22 = sadd.s32 1, %s2216_s16 }
   0x5   : > { %p119_p1 = scmp.ne.s32.totalorder %s2216_s16, %s2212_s15  ;;  %p120_p2 = scmp.eq.s32.totalorder %s1687_s20, 1 }
   0x6   : > { %s3233_s21 = smov (%p29_p0, %s27_s21), 0  ;;  %p1692_p4 = scmp.ge.s32.totalorder %s2228_s19, 1 }
   0x7   : > { %p2351_p3 = por %p120_p2, %p119_p1  ;;  %s106_s24 = ssub.s32 %s2224_s18, %s3233_s21 }
   0x8   : > { %p202_p5 = scmp.lt.s32.totalorder %s2228_s19, 3  ;;  %p107_p6 = scmp.eq.s32.totalorder %s106_s24, 0 }
   0xa   : > { %p203_p7 = pnand %p1692_p4, %p202_p5 }
   0xb   : > { %s2360_s25 = scalar_select %p107_p6, %s2216_s16, %s109_s22  }
   0xc   : > { %206 = sbr.rel (%p203_p7) target bundleno = 428 (0x1ac), region = 32  ;;  %s234_s10 = sand.u32 (!%p203_p7), 1, %s2212_s15  }
   0xd   : > { %s2366_s28 = smul.u32 (!%p203_p7), 26, %s2220_s17 }
   0xe   : > { %s2390_s11 = smul.u32 (!%p203_p7), 208, %s234_s10 }
   0xf   : > { %p248_p8 = scmp.lt.s32.totalorder (!%p203_p7), %s2366_s28, 48 }
  0x10   : > { %s2400_s14 = scalar_lea.vmem (!%p203_p7), [#allocation2], %s2390_s11   ;;  %s2495_s15 = scalar_lea.vmem (!%p203_p7), [#allocation3], %s2390_s11  }
  0x11   : > { %v1829_v0 = vld [vmem:[%s3153_s1 + $0x8] sm:$0xff]  ;;  %v1828_v1 = vld [vmem:[%s3153_s1] sm:$0xff]  ;;  %s249_s5 = scalar_select %p248_p8, %s2366_s28, 48  ;;  %vm388_vm0 = vcmask 261120  }
  0x12   : > { %1832 = vmatpush.bf16.msra.mxu1 %v1829_v0  ;;  %1833 = vmatpush.bf16.msra.mxu2 %v1829_v0  ;;  %v2395_v15 = vld [vmem:[%s3154_s2] ss:$0 sm:$0xff]  ;;  %s1060_s20 = ssub.s32 (%p2351_p3), 49, %s2366_s28  ;;  %s1830_s22 = smul.u32 (%p2351_p3), 208, %s2220_s17 }
  0x13   : > { %434 = vmatpush.bf16.msra.mxu0 %v1829_v0  ;;  %1834 = vmatpush.bf16.msra.mxu3 %v1829_v0  ;;  %s1693_s6 = sshll.u32 %s249_s5, 2  ;;  %p1061_p9 = scmp.lt.s32.totalorder (%p2351_p3), %s1060_s20, 26 }
  0x14   : > { %s254_s9 = scalar_lea.vmem %s3152_s0, %s1693_s6  ;;  %s2906_s27 = scalar_lea.vmem (%p2351_p3), %s3155_s3, %s1830_s22  }
  0x15   : > { %v1818_v2 = vld [vmem:[%s254_s9 + $0x18] sm:$0xff]  ;;  %v1815_v4 = vld [vmem:[%s254_s9] sm:$0xff]  ;;  %v1816_v8 = vld [vmem:[%s254_s9 + $0x8] sm:$0xff] }
  0x16   : > { %1835 = vmatpush.bf16.msra.mxu1 %v1828_v1  ;;  %1836 = vmatpush.bf16.msra.mxu2 %v1828_v1  ;;  %v1822_v3 = vld [vmem:[%s254_s9 + $0x38] sm:$0xff]  ;;  %v1819_v6 = vld [vmem:[%s254_s9 + $0x20] sm:$0xff]  ;;  %v1820_v10 = vld [vmem:[%s254_s9 + $0x28] sm:$0xff] }
  0x17   : > { %435 = vmatpush.bf16.msra.mxu0 %v1828_v1  ;;  %1837 = vmatpush.bf16.msra.mxu3 %v1828_v1  ;;  %v1826_v5 = vld [vmem:[%s254_s9 + $0x58] sm:$0xff]  ;;  %v1823_v7 = vld [vmem:[%s254_s9 + $0x40] sm:$0xff]  ;;  %v1824_v11 = vld [vmem:[%s254_s9 + $0x48] sm:$0xff] }
  0x18   : > { %v1827_v9 = vld [vmem:[%s254_s9 + $0x60] sm:$0xff]  ;;  %v1817_v12 = vld [vmem:[%s254_s9 + $0x10] sm:$0xff] }
  0x19   : > { %1757 = vmatmul.msk.bf16.vlgmr.msra.gmra.mxu1 %vm388_vm0, %v1818_v2  ;;  %1761 = vmatmul.msk.bf16.vlgmr.msra.gmra.mxu2 %vm388_vm0, %v1822_v3  ;;  %v1821_v13 = vld [vmem:[%s254_s9 + $0x30] sm:$0xff] }
  0x1a   : > { %1754 = vmatmul.msk.bf16.vlgmr.msra.gmra.mxu0 %vm388_vm0, %v1815_v4  ;;  %1765 = vmatmul.msk.bf16.vlgmr.msra.gmra.mxu3 %vm388_vm0, %v1826_v5  ;;  %v1825_v14 = vld [vmem:[%s254_s9 + $0x50] sm:$0xff] }
  0x29   : > { %1758 = vmatmul.msk.bf16.gmra.mxu1 %vm388_vm0, %v1819_v6  ;;  %1762 = vmatmul.msk.bf16.gmra.mxu2 %vm388_vm0, %v1823_v7 }
  0x2a   : > { %1755 = vmatmul.msk.bf16.gmra.mxu0 %vm388_vm0, %v1816_v8  ;;  %1766 = vmatmul.msk.bf16.gmra.mxu3 %vm388_vm0, %v1827_v9 }
  0x39   : > { %1759 = vmatmul.msk.bf16.gmra.mxu1 %vm388_vm0, %v1820_v10  ;;  %1763 = vmatmul.msk.bf16.gmra.mxu2 %vm388_vm0, %v1824_v11 }
  0x3a   : > { %1756 = vmatmul.msk.bf16.gmra.mxu0 %vm388_vm0, %v1817_v12 }
  0x49   : > { %1760 = vmatmul.msk.bf16.gmra.mxu1 %vm388_vm0, %v1821_v13  ;;  %1764 = vmatmul.msk.bf16.gmra.mxu2 %vm388_vm0, %v1825_v14 }
  0x96   : > { %v452_v16 = vpop.f32.mrf.mxu1 }
  0x97   : > { %v453_v17 = vadd.f32 %v2395_v15, %v452_v16  ;;  %v437_v18 = vpop.f32.mrf.mxu0 }
  0x98   : > { %v438_v19 = vadd.f32 %v2395_v15, %v437_v18 }
  0x99   : > { %508 = vst [vmem:[%s2400_s14 + $0x30] sm:$0xff] %v453_v17  ;;  %v1773_v20 = vmul.f32 -1.442695, %v453_v17 }
  0x9a   : > { %502 = vst [vmem:[%s2400_s14] sm:$0xff] %v438_v19  ;;  %v1767_v21 = vmul.f32 -1.442695, %v438_v19 }
  0x9b   : > { %2010 = vpow2.f32 %v1773_v20 }
  0x9c   : > { %2012 = vpow2.f32 %v1767_v21  ;;  %v472_v22 = vpop.f32.mrf.mxu2 }
  0x9d   : > { %v473_v23 = vadd.f32 %v2395_v15, %v472_v22  ;;  %v492_v24 = vpop.f32.mrf.mxu3 }
  0x9e   : > { %v454_v25 = vpop.f32.mrf.mxu1  ;;  %v493_v26 = vadd.f32 %v2395_v15, %v492_v24 }
  0x9f   : > { %516 = vst [vmem:[%s2400_s14 + $0x70] sm:$0xff] %v473_v23  ;;  %v1781_v27 = vmul.f32 -1.442695, %v473_v23  ;;  %v455_v28 = vadd.f32 %v2395_v15, %v454_v25  ;;  %v439_v29 = vpop.f32.mrf.mxu0 }
  0xa0   : > { %v440_v30 = vadd.f32 %v2395_v15, %v439_v29  ;;  %524 = vst [vmem:[%s2400_s14 + $0xb0] sm:$0xff] %v493_v26  ;;  %v1789_v31 = vmul.f32 -1.442695, %v493_v26 }
  0xa1   : > { %v2011_v32 = vpop.eup %2010  ;;  %2014 = vpow2.f32 %v1781_v27  ;;  %509 = vst [vmem:[%s2400_s14 + $0x38] sm:$0xff] %v455_v28  ;;  %v1774_v33 = vmul.f32 -1.442695, %v455_v28 }
  0xa2   : > { %v2013_v34 = vpop.eup %2012  ;;  %v2411_v35 = vadd.f32 1.0, %v2011_v32  ;;  %503 = vst [vmem:[%s2400_s14 + $0x8] sm:$0xff] %v440_v30  ;;  %v1768_v36 = vmul.f32 -1.442695, %v440_v30  ;;  %2016 = vpow2.f32 %v1789_v31 }
  0xa3   : > { %v2414_v37 = vadd.f32 1.0, %v2013_v34  ;;  %2018 = vpow2.f32 %v1774_v33 }
  0xa4   : > { %2020 = vrcp.f32 %v2411_v35  ;;  %v474_v38 = vpop.f32.mrf.mxu2  ;;  %v733_v39 = vand.u32 2147483648, %v2411_v35  ;;  %v731_v45 = vand.u32 2147483647, %v2411_v35  ;;  %vm727_vm1 = vweird.f32 %v2411_v35 }
  0xa5   : > { %2022 = vrcp.f32 %v2414_v37  ;;  %v641_v40 = vand.u32 2147483647, %v2414_v37  ;;  %v475_v41 = vadd.f32 %v2395_v15, %v474_v38  ;;  %v494_v43 = vpop.f32.mrf.mxu3  ;;  %v643_v46 = vand.u32 2147483648, %v2414_v37 }
  0xa6   : > { %2024 = vpow2.f32 %v1768_v36  ;;  %v457_v42 = vpop.f32.mrf.mxu1  ;;  %v495_v53 = vadd.f32 %v2395_v15, %v494_v43  ;;  %vm637_vm2 = vweird.f32 %v2414_v37  ;;  %v734_v56 = vor.u32 1.1754944e-38, %v733_v39 }
  0xa7   : > { %v2015_v44 = vpop.eup %2014  ;;  %v458_v47 = vadd.f32 %v2395_v15, %v457_v42  ;;  %v442_v48 = vpop.f32.mrf.mxu0  ;;  %517 = vst [vmem:[%s2400_s14 + $0x78] sm:$0xff] %v475_v41  ;;  %v1782_v51 = vmul.f32 -1.442695, %v475_v41  ;;  %vm2432_vm3 = vcmp.eq.f32.partialorder %v641_v40, 8.507059e+37  ;;  %vm2439_vm4 = vcmp.eq.f32.partialorder %v731_v45, 8.507059e+37 }
  0xa8   : > { %v2017_v49 = vpop.eup %2016  ;;  %v2424_v50 = vadd.f32 1.0, %v2015_v44  ;;  %v443_v52 = vadd.f32 %v2395_v15, %v442_v48  ;;  %525 = vst [vmem:[%s2400_s14 + $0xb8] sm:$0xff] %v495_v53  ;;  %v644_v2 = vor.u32 1.1754944e-38, %v643_v46  ;;  %v2450_v4 = vmul.f32 -1.442695, %v495_v53 }
  0xa9   : > { %v2019_v54 = vpop.eup %2018  ;;  %510 = vst [vmem:[%s2400_s14 + $0x40] sm:$0xff] %v458_v47  ;;  %v1775_v58 = vmul.f32 -1.442695, %v458_v47  ;;  %v2445_v63 = vadd.f32 1.0, %v2017_v49 }
  0xaa   : > { %v2021_v55 = vpop.eup %2020  ;;  %2026 = vrcp.f32 %v2424_v50  ;;  %504 = vst [vmem:[%s2400_s14 + $0x10] sm:$0xff] %v443_v52  ;;  %v2443_v62 = vadd.f32 1.0, %v2019_v54  ;;  %v851_v3 = vand.u32 2147483647, %v2424_v50  ;;  %v853_v6 = vand.u32 2147483648, %v2424_v50 }
  0xab   : > { %v2023_v59 = vpop.eup %2022  ;;  %v723_v60 = vmul.f32 %v2021_v55, %v2411_v35  ;;  %2028 = vpow2.f32 %v1782_v51  ;;  %vm728_vm5 = vweird.f32 %v2021_v55  ;;  %v1769_v11 = vmul.f32 -1.442695, %v443_v52 }
  0xac   : > { %v2025_v0 = vpop.eup %2024  ;;  %v633_v1 = vmul.f32 %v2023_v59, %v2414_v37  ;;  %2030 = vrcp.f32 %v2443_v62  ;;  %vm638_vm6 = vweird.f32 %v2023_v59  ;;  %v748_v10 = vand.u32 2147483648, %v2443_v62  ;;  %vm729_vm10 = vmor %vm727_vm1, %vm728_vm5  ;;  %v2490_v35 = vpop.f32.mrf.mxu2 }
  0xad   : > { %v724_v5 = vsub.f32 1.0, %v723_v60  ;;  %v2454_v8 = vadd.f32 1.0, %v2025_v0  ;;  %2032 = vpow2.f32 %v1775_v58  ;;  %vm847_vm7 = vweird.f32 %v2424_v50  ;;  %vm2463_vm8 = vmor %vm637_vm2, %vm638_vm6 }
  0xae   : > { %v634_v7 = vsub.f32 1.0, %v633_v1  ;;  %2034 = vrcp.f32 %v2445_v63  ;;  %v746_v14 = vand.u32 2147483647, %v2443_v62  ;;  %vm2468_vm9 = vcmp.eq.f32.partialorder %v851_v3, 8.507059e+37  ;;  %v2501_v39 = vpop.f32.mrf.mxu1 }
  0xaf   : > { %v725_v9 = vmul.f32 %v2021_v55, %v724_v5  ;;  %2036 = vrcp.f32 %v2454_v8  ;;  %v854_v21 = vor.u32 1.1754944e-38, %v853_v6  ;;  %vm742_vm11 = vweird.f32 %v2443_v62  ;;  %v444_v53 = vpop.f32.mrf.mxu0 }
  0xb0   : > { %v2027_v12 = vpop.eup %2026  ;;  %v635_v13 = vmul.f32 %v2023_v59, %v634_v7  ;;  %v656_v23 = vand.u32 2147483647, %v2454_v8  ;;  %2038 = vpow2.f32 %v1769_v11  ;;  %v749_v28 = vor.u32 1.1754944e-38, %v748_v10 }
  0xb1   : > { %v2029_v16 = vpop.eup %2028  ;;  %v726_v17 = vadd.f32 %v2021_v55, %v725_v9  ;;  %v843_v19 = vmul.f32 %v2027_v12, %v2424_v50  ;;  %vm652_vm12 = vweird.f32 %v2454_v8  ;;  %vm2485_vm13 = vcmp.eq.f32.partialorder %v746_v14, 8.507059e+37 }
  0xb2   : > { %v636_v22 = vadd.f32 %v2023_v59, %v635_v13  ;;  %v2477_v24 = vadd.f32 1.0, %v2029_v16  ;;  %v2031_v25 = vpop.eup %2030  ;;  %v658_v34 = vand.u32 2147483648, %v2454_v8  ;;  %vm848_vm14 = vweird.f32 %v2027_v12 }
  0xb3   : > { %v730_v26 = vsel %vm729_vm10, %v2021_v55, %v726_v17  ;;  %v844_v27 = vsub.f32 1.0, %v843_v19  ;;  %v2033_v29 = vpop.eup %2032  ;;  %v738_v32 = vmul.f32 %v2031_v25, %v2443_v62  ;;  %vm743_vm15 = vweird.f32 %v2031_v25  ;;  %vm849_vm2 = vmor %vm847_vm7, %vm848_vm14 }
  0xb4   : > { %v735_v30 = vsel %vm2439_vm4, %v734_v56, %v730_v26  ;;  %v640_v31 = vsel %vm2463_vm8, %v2023_v59, %v636_v22  ;;  %v2492_v36 = vpop.eup %2034  ;;  %2040 = vrcp.f32 %v2477_v24  ;;  %vm2504_vm0 = vcmp.eq.f32.partialorder %v656_v23, 8.507059e+37  ;;  %vm744_vm5 = vmor %vm742_vm11, %vm743_vm15  ;;  %v479_v11 = vpop.f32.mrf.mxu2 }
  0xb5   : > { %1028 = vst [vmem:[%s2495_s15 + $0x30] sm:$0xff] %v735_v30  ;;  %v645_v37 = vsel %vm2432_vm3, %v644_v2, %v640_v31  ;;  %v845_v38 = vmul.f32 %v2027_v12, %v844_v27  ;;  %v2037_v40 = vpop.eup %2036  ;;  %v739_v41 = vsub.f32 1.0, %v738_v32  ;;  %vm967_vm1 = vweird.f32 %v2445_v63 }
  0xb6   : > { %1022 = vst [vmem:[%s2495_s15] sm:$0xff] %v645_v37  ;;  %v648_v44 = vmul.f32 %v2037_v40, %v2454_v8  ;;  %v868_v45 = vand.u32 2147483648, %v2477_v24  ;;  %v2511_v46 = vadd.f32 1.0, %v2033_v29  ;;  %v2039_v47 = vpop.eup %2038  ;;  %v659_v49 = vor.u32 1.1754944e-38, %v658_v34  ;;  %v462_v18 = vpop.f32.mrf.mxu1 }
  0xb7   : > { %v846_v43 = vadd.f32 %v2027_v12, %v845_v38  ;;  %v740_v48 = vmul.f32 %v2031_v25, %v739_v41  ;;  %v866_v51 = vand.u32 2147483647, %v2477_v24  ;;  %v963_v52 = vmul.f32 %v2492_v36, %v2445_v63  ;;  %v447_v32 = vpop.f32.mrf.mxu0 }
  0xb8   : > { %v649_v55 = vsub.f32 1.0, %v648_v44  ;;  %vm653_vm3 = vweird.f32 %v2037_v40  ;;  %2042 = vrcp.f32 %v2511_v46  ;;  %vm862_vm4 = vweird.f32 %v2477_v24 }
  0xb9   : > { %v850_v54 = vsel %vm849_vm2, %v2027_v12, %v846_v43  ;;  %v741_v57 = vadd.f32 %v2031_v25, %v740_v48  ;;  %v763_v50 = vand.u32 2147483648, %v2511_v46  ;;  %v869_v60 = vor.u32 1.1754944e-38, %v868_v45  ;;  %vm2531_vm6 = vmor %vm652_vm12, %vm653_vm3 }
  0xba   : > { %v855_v56 = vsel %vm2468_vm9, %v854_v21, %v850_v54  ;;  %v2041_v58 = vpop.eup %2040  ;;  %v650_v59 = vmul.f32 %v2037_v40, %v649_v55  ;;  %v2527_v61 = vadd.f32 1.0, %v2039_v47  ;;  %v964_v0 = vsub.f32 1.0, %v963_v52  ;;  %v497_v47 = vpop.f32.mrf.mxu3 }
  0xbb   : > { %1036 = vst [vmem:[%s2495_s15 + $0x70] sm:$0xff] %v855_v56  ;;  %v745_v1 = vsel %vm744_vm5, %v2031_v25, %v741_v57  ;;  %v858_v3 = vmul.f32 %v2041_v58, %v2477_v24  ;;  %vm2536_vm7 = vcmp.eq.f32.partialorder %v866_v51, 8.507059e+37  ;;  %vm757_vm8 = vweird.f32 %v2511_v46 }
  0xbc   : > { %v761_v62 = vand.u32 2147483647, %v2511_v46  ;;  %v750_v6 = vsel %vm2485_vm13, %v749_v28, %v745_v1  ;;  %v651_v7 = vadd.f32 %v2037_v40, %v650_v59  ;;  %2044 = vrcp.f32 %v2527_v61  ;;  %v482_v55 = vpop.f32.mrf.mxu2 }
  0xbd   : > { %vm968_vm9 = vweird.f32 %v2492_v36  ;;  %1029 = vst [vmem:[%s2495_s15 + $0x38] sm:$0xff] %v750_v6  ;;  %v859_v8 = vsub.f32 1.0, %v858_v3  ;;  %vm863_vm10 = vweird.f32 %v2041_v58  ;;  %v764_v9 = vor.u32 1.1754944e-38, %v763_v50 }
  0xbe   : > { %v671_v10 = vand.u32 2147483647, %v2527_v61  ;;  %v2043_v12 = vpop.eup %2042  ;;  %v655_v13 = vsel %vm2531_vm6, %v2037_v40, %v651_v7  ;;  %v965_v14 = vmul.f32 %v2492_v36, %v964_v0  ;;  %v971_v16 = vand.u32 2147483647, %v2445_v63  ;;  %vm2565_vm13 = vmor %vm967_vm1, %vm968_vm9  ;;  %v464_v59 = vpop.f32.mrf.mxu1 }
  0xbf   : > { %v973_v17 = vand.u32 2147483648, %v2445_v63  ;;  %v660_v19 = vsel %vm2504_vm0, %v659_v49, %v655_v13  ;;  %v860_v20 = vmul.f32 %v2041_v58, %v859_v8  ;;  %v753_v21 = vmul.f32 %v2043_v12, %v2511_v46  ;;  %vm864_vm1 = vmor %vm862_vm4, %vm863_vm10 }
  0xc0   : > { %vm2556_vm11 = vcmp.eq.f32.partialorder %v761_v62, 8.507059e+37  ;;  %vm667_vm12 = vweird.f32 %v2527_v61  ;;  %1023 = vst [vmem:[%s2495_s15 + $0x8] sm:$0xff] %v660_v19  ;;  %vm758_vm14 = vweird.f32 %v2043_v12  ;;  %v673_v25 = vand.u32 2147483648, %v2527_v61  ;;  %v449_v62 = vpop.f32.mrf.mxu0 }
  0xc1   : > { %v966_v26 = vadd.f32 %v2492_v36, %v965_v14  ;;  %vm2572_vm15 = vcmp.eq.f32.partialorder %v971_v16, 8.507059e+37  ;;  %v861_v28 = vadd.f32 %v2041_v58, %v860_v20  ;;  %v754_v29 = vsub.f32 1.0, %v753_v21  ;;  %vm759_vm3 = vmor %vm757_vm8, %vm758_vm14 }
  0xc2   : > { %vm2576_vm0 = vcmp.eq.f32.partialorder %v671_v10, 8.507059e+37  ;;  %v974_v63 = vor.u32 1.1754944e-38, %v973_v17  ;;  %v478_v31 = vadd.f32 %v2395_v15, %v2490_v35  ;;  %v2045_v33 = vpop.eup %2044  ;;  %v460_v37 = vadd.f32 %v2395_v15, %v2501_v39 }
  0xc3   : > { %v970_v34 = vsel %vm2565_vm13, %v2492_v36, %v966_v26  ;;  %v445_v38 = vadd.f32 %v2395_v15, %v444_v53  ;;  %2046 = vpow2.f32 %v2450_v4  ;;  %v865_v35 = vsel %vm864_vm1, %v2041_v58, %v861_v28 }
  0xc4   : > { %v755_v40 = vmul.f32 %v2043_v12, %v754_v29  ;;  %v663_v41 = vmul.f32 %v2045_v33, %v2527_v61  ;;  %vm668_vm2 = vweird.f32 %v2045_v33  ;;  %518 = vst [vmem:[%s2400_s14 + $0x80] sm:$0xff] %v478_v31  ;;  %v870_v24 = vsel %vm2536_vm7, %v869_v60, %v865_v35 }
  0xc5   : > { %v975_v36 = vsel %vm2572_vm15, %v974_v63, %v970_v34  ;;  %v1783_v42 = vmul.f32 -1.442695, %v478_v31  ;;  %511 = vst [vmem:[%s2400_s14 + $0x48] sm:$0xff] %v460_v37  ;;  %v1776_v39 = vmul.f32 -1.442695, %v460_v37  ;;  %v480_v45 = vadd.f32 %v2395_v15, %v479_v11  ;;  %vm2614_vm4 = vmor %vm667_vm12, %vm668_vm2 }
  0xc6   : > { %1037 = vst [vmem:[%s2495_s15 + $0x78] sm:$0xff] %v870_v24  ;;  %v756_v43 = vadd.f32 %v2043_v12, %v755_v40  ;;  %v664_v4 = vsub.f32 1.0, %v663_v41  ;;  %v1770_v44 = vmul.f32 -1.442695, %v445_v38  ;;  %v463_v48 = vadd.f32 %v2395_v15, %v462_v18  ;;  %v2671_v40 = vpop.f32.mrf.mxu2 }
  0xc7   : > { %1044 = vst [vmem:[%s2495_s15 + $0xb0] sm:$0xff] %v975_v36  ;;  %2048 = vpow2.f32 %v1783_v42  ;;  %v448_v49 = vadd.f32 %v2395_v15, %v447_v32  ;;  %v498_v51 = vadd.f32 %v2395_v15, %v497_v47  ;;  %v1784_v54 = vmul.f32 -1.442695, %v480_v45 }
  0xc8   : > { %v760_v52 = vsel %vm759_vm3, %v2043_v12, %v756_v43  ;;  %v665_v53 = vmul.f32 %v2045_v33, %v664_v4  ;;  %2050 = vpow2.f32 %v1776_v39  ;;  %505 = vst [vmem:[%s2400_s14 + $0x18] sm:$0xff] %v445_v38  ;;  %v674_v50 = vor.u32 1.1754944e-38, %v673_v25 }
  0xc9   : > { %v2047_v56 = vpop.eup %2046  ;;  %v765_v46 = vsel %vm2556_vm11, %v764_v9, %v760_v52  ;;  %2052 = vpow2.f32 %v1770_v44  ;;  %519 = vst [vmem:[%s2400_s14 + $0x88] sm:$0xff] %v480_v45  ;;  %v1777_v58 = vmul.f32 -1.442695, %v463_v48  ;;  %v1771_v1 = vmul.f32 -1.442695, %v448_v49 }
  0xca   : > { %1030 = vst [vmem:[%s2495_s15 + $0x40] sm:$0xff] %v765_v46  ;;  %v666_v60 = vadd.f32 %v2045_v33, %v665_v53  ;;  %v2620_v0 = vadd.f32 1.0, %v2047_v56  ;;  %2054 = vpow2.f32 %v1784_v54  ;;  %v1791_v61 = vmul.f32 -1.442695, %v498_v51 }
  0xcb   : > { %512 = vst [vmem:[%s2400_s14 + $0x50] sm:$0xff] %v463_v48  ;;  %v483_v2 = vadd.f32 %v2395_v15, %v482_v55  ;;  %v465_v5 = vadd.f32 %v2395_v15, %v464_v59  ;;  %v450_v16 = vadd.f32 %v2395_v15, %v449_v62 }
  0xcc   : > { %v670_v3 = vsel %vm2614_vm4, %v2045_v33, %v666_v60  ;;  %2056 = vrcp.f32 %v2620_v0  ;;  %506 = vst [vmem:[%s2400_s14 + $0x20] sm:$0xff] %v448_v49  ;;  %v986_v8 = vand.u32 2147483647, %v2620_v0  ;;  %v988_v11 = vand.u32 2147483648, %v2620_v0 }
  0xcd   : > { %v2049_v6 = vpop.eup %2048  ;;  %v675_v7 = vsel %vm2576_vm0, %v674_v50, %v670_v3  ;;  %2058 = vpow2.f32 %v1777_v58  ;;  %526 = vst [vmem:[%s2400_s14 + $0xc0] sm:$0xff] %v498_v51  ;;  %v1785_v14 = vmul.f32 -1.442695, %v483_v2  ;;  %vm982_vm5 = vweird.f32 %v2620_v0 }
  0xce   : > { %v2051_v9 = vpop.eup %2050  ;;  %1024 = vst [vmem:[%s2495_s15 + $0x10] sm:$0xff] %v675_v7  ;;  %v2634_v10 = vadd.f32 1.0, %v2049_v6  ;;  %2060 = vpow2.f32 %v1771_v1  ;;  %vm2645_vm6 = vcmp.eq.f32.partialorder %v986_v8, 8.507059e+37  ;;  %v989_v21 = vor.u32 1.1754944e-38, %v988_v11 }
  0xcf   : > { %v2053_v12 = vpop.eup %2052  ;;  %v2637_v13 = vadd.f32 1.0, %v2051_v9  ;;  %2062 = vpow2.f32 %v1791_v61  ;;  %520 = vst [vmem:[%s2400_s14 + $0x90] sm:$0xff] %v483_v2  ;;  %v2654_v23 = vmul.f32 -1.442695, %v465_v5  ;;  %v2662_v31 = vmul.f32 -1.442695, %v450_v16 }
  0xd0   : > { %v2055_v17 = vpop.eup %2054  ;;  %2064 = vrcp.f32 %v2634_v10  ;;  %513 = vst [vmem:[%s2400_s14 + $0x58] sm:$0xff] %v465_v5  ;;  %v2650_v20 = vadd.f32 1.0, %v2053_v12  ;;  %v881_v26 = vand.u32 2147483647, %v2634_v10  ;;  %v883_v27 = vand.u32 2147483648, %v2634_v10 }
  0xd1   : > { %2066 = vrcp.f32 %v2637_v13  ;;  %507 = vst [vmem:[%s2400_s14 + $0x28] sm:$0xff] %v450_v16  ;;  %v2652_v22 = vadd.f32 1.0, %v2055_v17  ;;  %v776_v30 = vand.u32 2147483647, %v2637_v13  ;;  %v778_v63 = vand.u32 2147483648, %v2637_v13 }
  0xd2   : > { %v2057_v19 = vpop.eup %2056  ;;  %2068 = vpow2.f32 %v1785_v14  ;;  %v686_v33 = vand.u32 2147483647, %v2650_v20  ;;  %vm877_vm8 = vweird.f32 %v2634_v10  ;;  %vm772_vm9 = vweird.f32 %v2637_v13 }
  0xd3   : > { %v2059_v25 = vpop.eup %2058  ;;  %v978_v28 = vmul.f32 %v2057_v19, %v2620_v0  ;;  %2070 = vrcp.f32 %v2650_v20  ;;  %vm983_vm7 = vweird.f32 %v2057_v19  ;;  %v688_v38 = vand.u32 2147483648, %v2650_v20 }
  0xd4   : > { %v2061_v29 = vpop.eup %2060  ;;  %2072 = vrcp.f32 %v2652_v22  ;;  %v2669_v35 = vadd.f32 1.0, %v2059_v25  ;;  %vm2674_vm10 = vcmp.eq.f32.partialorder %v881_v26, 8.507059e+37  ;;  %v884_v42 = vor.u32 1.1754944e-38, %v883_v27  ;;  %vm2686_vm12 = vmor %vm982_vm5, %vm983_vm7 }
  0xd5   : > { %v2063_v32 = vpop.eup %2062  ;;  %v979_v34 = vsub.f32 1.0, %v978_v28  ;;  %vm2679_vm11 = vcmp.eq.f32.partialorder %v776_v30, 8.507059e+37  ;;  %v779_v44 = vor.u32 1.1754944e-38, %v778_v63  ;;  %v896_v47 = vand.u32 2147483647, %v2652_v22 }
  0xd6   : > { %v2065_v37 = vpop.eup %2064  ;;  %2074 = vrcp.f32 %v2669_v35  ;;  %vm682_vm13 = vweird.f32 %v2650_v20  ;;  %vm2695_vm14 = vcmp.eq.f32.partialorder %v686_v33, 8.507059e+37  ;;  %v689_v55 = vor.u32 1.1754944e-38, %v688_v38 }
  0xd7   : > { %v2067_v41 = vpop.eup %2066  ;;  %v873_v24 = vmul.f32 %v2065_v37, %v2634_v10  ;;  %v980_v39 = vmul.f32 %v2057_v19, %v979_v34  ;;  %vm892_vm15 = vweird.f32 %v2652_v22  ;;  %v898_v56 = vand.u32 2147483648, %v2652_v22  ;;  %v2725_v10 = vpop.f32.mrf.mxu1 }
  0xd8   : > { %v768_v43 = vmul.f32 %v2067_v41, %v2637_v13  ;;  %v2692_v48 = vpop.eup %2068  ;;  %v2701_v46 = vadd.f32 1.0, %v2061_v29  ;;  %vm878_vm0 = vweird.f32 %v2065_v37  ;;  %vm773_vm1 = vweird.f32 %v2067_v41 }
  0xd9   : > { %v874_v49 = vsub.f32 1.0, %v873_v24  ;;  %v981_v52 = vadd.f32 %v2057_v19, %v980_v39  ;;  %v2071_v53 = vpop.eup %2070  ;;  %vm2709_vm2 = vcmp.eq.f32.partialorder %v896_v47, 8.507059e+37  ;;  %v791_v5 = vand.u32 2147483647, %v2669_v35  ;;  %vm879_vm4 = vmor %vm877_vm8, %vm878_vm0 }
  0xda   : > { %v769_v54 = vsub.f32 1.0, %v768_v43  ;;  %v2073_v57 = vpop.eup %2072  ;;  %v678_v58 = vmul.f32 %v2071_v53, %v2650_v20  ;;  %vm683_vm3 = vweird.f32 %v2071_v53  ;;  %2076 = vrcp.f32 %v2701_v46  ;;  %vm774_vm5 = vmor %vm772_vm9, %vm773_vm1 }
  0xdb   : > { %v875_v50 = vmul.f32 %v2065_v37, %v874_v49  ;;  %v985_v59 = vsel %vm2686_vm12, %v2057_v19, %v981_v52  ;;  %v888_v1 = vmul.f32 %v2073_v57, %v2652_v22  ;;  %v2718_v8 = vadd.f32 1.0, %v2063_v32  ;;  %v487_v19 = vpop.f32.mrf.mxu2 }
  0xdc   : > { %v770_v60 = vmul.f32 %v2067_v41, %v769_v54  ;;  %v990_v0 = vsel %vm2645_vm6, %v989_v21, %v985_v59  ;;  %v679_v3 = vsub.f32 1.0, %v678_v58  ;;  %v2075_v62 = vpop.eup %2074  ;;  %v793_v14 = vand.u32 2147483648, %v2669_v35  ;;  %vm2732_vm6 = vmor %vm682_vm13, %vm683_vm3 }
  0xdd   : > { %v876_v2 = vadd.f32 %v2065_v37, %v875_v50  ;;  %1045 = vst [vmem:[%s2495_s15 + $0xb8] sm:$0xff] %v990_v0  ;;  %v889_v7 = vsub.f32 1.0, %v888_v1  ;;  %v783_v12 = vmul.f32 %v2075_v62, %v2669_v35  ;;  %vm893_vm7 = vweird.f32 %v2073_v57 }
  0xde   : > { %v771_v6 = vadd.f32 %v2067_v41, %v770_v60  ;;  %v680_v11 = vmul.f32 %v2071_v53, %v679_v3  ;;  %v899_v26 = vor.u32 1.1754944e-38, %v898_v56  ;;  %vm787_vm8 = vweird.f32 %v2669_v35  ;;  %vm894_vm9 = vmor %vm892_vm15, %vm893_vm7 }
  0xdf   : > { %v880_v9 = vsel %vm879_vm4, %v2065_v37, %v876_v2  ;;  %v890_v13 = vmul.f32 %v2073_v57, %v889_v7  ;;  %v784_v27 = vsub.f32 1.0, %v783_v12  ;;  %v701_v20 = vand.u32 2147483647, %v2701_v46  ;;  %v469_v54 = vpop.f32.mrf.mxu1 }
  0xe0   : > { %v885_v16 = vsel %vm2674_vm10, %v884_v42, %v880_v9  ;;  %v775_v17 = vsel %vm774_vm5, %v2067_v41, %v771_v6  ;;  %v681_v25 = vadd.f32 %v2071_v53, %v680_v11  ;;  %2078 = vrcp.f32 %v2718_v8  ;;  %v2077_v32 = vpop.eup %2076  ;;  %v499_v42 = vpop.f32.mrf.mxu3 }
  0xe1   : > { %1038 = vst [vmem:[%s2495_s15 + $0x80] sm:$0xff] %v885_v16  ;;  %v780_v21 = vsel %vm2679_vm11, %v779_v44, %v775_v17  ;;  %v891_v28 = vadd.f32 %v2073_v57, %v890_v13  ;;  %v785_v30 = vmul.f32 %v2075_v62, %v784_v27  ;;  %vm788_vm10 = vweird.f32 %v2075_v62 }
  0xe2   : > { %1031 = vst [vmem:[%s2495_s15 + $0x48] sm:$0xff] %v780_v21  ;;  %v685_v29 = vsel %vm2732_vm6, %v2071_v53, %v681_v25  ;;  %vm2747_vm11 = vcmp.eq.f32.partialorder %v791_v5, 8.507059e+37  ;;  %v794_v37 = vor.u32 1.1754944e-38, %v793_v14  ;;  %v2754_v38 = vadd.f32 1.0, %v2692_v48  ;;  %vm789_vm12 = vmor %vm787_vm8, %vm788_vm10 }
  0xe3   : > { %v690_v33 = vsel %vm2695_vm14, %v689_v55, %v685_v29  ;;  %v895_v34 = vsel %vm894_vm9, %v2073_v57, %v891_v28  ;;  %v786_v41 = vadd.f32 %v2075_v62, %v785_v30  ;;  %v693_v24 = vmul.f32 %v2077_v32, %v2701_v46  ;;  %v489_v56 = vpop.f32.mrf.mxu2 }
  0xe4   : > { %1025 = vst [vmem:[%s2495_s15 + $0x18] sm:$0xff] %v690_v33  ;;  %v900_v22 = vsel %vm2709_vm2, %v899_v26, %v895_v34  ;;  %v703_v36 = vand.u32 2147483648, %v2701_v46  ;;  %vm697_vm13 = vweird.f32 %v2701_v46  ;;  %vm2765_vm14 = vcmp.eq.f32.partialorder %v701_v20, 8.507059e+37 }
  0xe5   : > { %1039 = vst [vmem:[%s2495_s15 + $0x88] sm:$0xff] %v900_v22  ;;  %vm997_vm15 = vweird.f32 %v2718_v8  ;;  %2080 = vrcp.f32 %v2754_v38  ;;  %v790_v43 = vsel %vm789_vm12, %v2075_v62, %v786_v41  ;;  %v694_v4 = vsub.f32 1.0, %v693_v24 }
  0xe6   : > { %vm698_vm0 = vweird.f32 %v2077_v32  ;;  %v1001_v44 = vand.u32 2147483647, %v2718_v8  ;;  %v2079_v45 = vpop.eup %2078  ;;  %v795_v35 = vsel %vm2747_vm11, %v794_v37, %v790_v43  ;;  %2082 = vpow2.f32 %v2654_v23 }
  0xe7   : > { %v500_v47 = vadd.f32 %v2395_v15, %v499_v42  ;;  %v485_v48 = vadd.f32 %v2395_v15, %v2671_v40  ;;  %1032 = vst [vmem:[%s2495_s15 + $0x50] sm:$0xff] %v795_v35  ;;  %v695_v49 = vmul.f32 %v2077_v32, %v694_v4  ;;  %v704_v51 = vor.u32 1.1754944e-38, %v703_v36  ;;  %vm2783_vm1 = vmor %vm697_vm13, %vm698_vm0 }
  0xe8   : > { %v993_v52 = vmul.f32 %v2079_v45, %v2718_v8  ;;  %v1003_v53 = vand.u32 2147483648, %v2718_v8  ;;  %vm998_vm2 = vweird.f32 %v2079_v45  ;;  %2084 = vpow2.f32 %v2662_v31 }
  0xe9   : > { %527 = vst [vmem:[%s2400_s14 + $0xc8] sm:$0xff] %v500_v47  ;;  %v1792_v23 = vmul.f32 -1.442695, %v500_v47  ;;  %v1786_v40 = vmul.f32 -1.442695, %v485_v48  ;;  %v696_v57 = vadd.f32 %v2077_v32, %v695_v49  ;;  %v468_v58 = vadd.f32 %v2395_v15, %v2725_v10  ;;  %vm2808_vm4 = vmor %vm997_vm15, %vm998_vm2 }
  0xea   : > { %v994_v50 = vsub.f32 1.0, %v993_v52  ;;  %521 = vst [vmem:[%s2400_s14 + $0x98] sm:$0xff] %v485_v48  ;;  %v488_v46 = vadd.f32 %v2395_v15, %v487_v19  ;;  %vm2793_vm3 = vcmp.eq.f32.partialorder %v1001_v44, 8.507059e+37  ;;  %v470_v31 = vadd.f32 %v2395_v15, %v469_v54 }
  0xeb   : > { %v2081_v59 = vpop.eup %2080  ;;  %2086 = vpow2.f32 %v1792_v23  ;;  %v700_v0 = vsel %vm2783_vm1, %v2077_v32, %v696_v57  ;;  %514 = vst [vmem:[%s2400_s14 + $0x60] sm:$0xff] %v468_v58  ;;  %v490_v2 = vadd.f32 %v2395_v15, %v489_v56  ;;  %v1004_v6 = vor.u32 1.1754944e-38, %v1003_v53 }
  0xec   : > { %v995_v1 = vmul.f32 %v2079_v45, %v994_v50  ;;  %v903_v61 = vmul.f32 %v2081_v59, %v2754_v38  ;;  %v2083_v3 = vpop.eup %2082  ;;  %v705_v5 = vsel %vm2765_vm14, %v704_v51, %v700_v0  ;;  %2088 = vpow2.f32 %v1786_v40  ;;  %522 = vst [vmem:[%s2400_s14 + $0xa0] sm:$0xff] %v488_v46 }
  0xed   : > { %v1779_v7 = vmul.f32 -1.442695, %v468_v58  ;;  %1026 = vst [vmem:[%s2495_s15 + $0x20] sm:$0xff] %v705_v5  ;;  %v2814_v11 = vadd.f32 1.0, %v2083_v3  ;;  %v1787_v12 = vmul.f32 -1.442695, %v488_v46  ;;  %vm908_vm5 = vweird.f32 %v2081_v59 }
  0xee   : > { %v996_v9 = vadd.f32 %v2079_v45, %v995_v1  ;;  %v904_v15 = vsub.f32 1.0, %v903_v61  ;;  %v2085_v14 = vpop.eup %2084  ;;  %v911_v10 = vand.u32 2147483647, %v2754_v38  ;;  %v913_v8 = vand.u32 2147483648, %v2754_v38  ;;  %515 = vst [vmem:[%s2400_s14 + $0x68] sm:$0xff] %v470_v31 }
  0xef   : > { %2090 = vpow2.f32 %v1779_v7  ;;  %523 = vst [vmem:[%s2400_s14 + $0xa8] sm:$0xff] %v490_v2  ;;  %v611_v19 = vadd.f32 1.0, %v2085_v14  ;;  %vm907_vm6 = vweird.f32 %v2754_v38  ;;  %v806_v20 = vand.u32 2147483647, %v2814_v11 }
  0xf0   : > { %v1000_v16 = vsel %vm2808_vm4, %v2079_v45, %v996_v9  ;;  %v905_v17 = vmul.f32 %v2081_v59, %v904_v15  ;;  %2092 = vrcp.f32 %v2814_v11  ;;  %vm909_vm7 = vmor %vm907_vm6, %vm908_vm5  ;;  %vm912_vm8 = vcmp.eq.f32.partialorder %v911_v10, 8.507059e+37 }
  0xf1   : > { %v2087_v18 = vpop.eup %2086  ;;  %v1005_v13 = vsel %vm2793_vm3, %v1004_v6, %v1000_v16  ;;  %2094 = vpow2.f32 %v1787_v12  ;;  %v914_v27 = vor.u32 1.1754944e-38, %v913_v8  ;;  %v808_v29 = vand.u32 2147483648, %v2814_v11 }
  0xf2   : > { %1046 = vst [vmem:[%s2495_s15 + $0xc0] sm:$0xff] %v1005_v13  ;;  %v906_v21 = vadd.f32 %v2081_v59, %v905_v17  ;;  %v631_v25 = vadd.f32 1.0, %v2087_v18  ;;  %v2089_v26 = vpop.eup %2088  ;;  %2096 = vrcp.f32 %v611_v19  ;;  %v716_v38 = vand.u32 2147483647, %v611_v19 }
  0xf3   : > { %v2830_v33 = vadd.f32 1.0, %v2089_v26  ;;  %v1780_v22 = vmul.f32 -1.442695, %v470_v31  ;;  %v1788_v41 = vmul.f32 -1.442695, %v490_v2  ;;  %vm802_vm9 = vweird.f32 %v2814_v11 }
  0xf4   : > { %v910_v28 = vsel %vm909_vm7, %v2081_v59, %v906_v21  ;;  %2098 = vrcp.f32 %v631_v25  ;;  %vm2836_vm10 = vcmp.eq.f32.partialorder %v806_v20, 8.507059e+37  ;;  %v809_v42 = vor.u32 1.1754944e-38, %v808_v29 }
  0xf5   : > { %v2091_v30 = vpop.eup %2090  ;;  %v915_v63 = vsel %vm912_vm8, %v914_v27, %v910_v28  ;;  %2100 = vrcp.f32 %v2830_v33  ;;  %vm712_vm11 = vweird.f32 %v611_v19  ;;  %v718_v4 = vand.u32 2147483648, %v611_v19 }
  0xf6   : > { %v2093_v32 = vpop.eup %2092  ;;  %1040 = vst [vmem:[%s2495_s15 + $0x90] sm:$0xff] %v915_v63  ;;  %v2832_v34 = vadd.f32 1.0, %v2091_v30  ;;  %vm1012_vm12 = vweird.f32 %v631_v25  ;;  %v1016_v35 = vand.u32 2147483647, %v631_v25  ;;  %v1018_v47 = vand.u32 2147483648, %v631_v25 }
  0xf7   : > { %v798_v37 = vmul.f32 %v2093_v32, %v2814_v11  ;;  %v2095_v24 = vpop.eup %2094  ;;  %vm803_vm13 = vweird.f32 %v2093_v32  ;;  %vm2842_vm14 = vcmp.eq.f32.partialorder %v716_v38, 8.507059e+37  ;;  %v719_v56 = vor.u32 1.1754944e-38, %v718_v4 }
  0xf8   : > { %v2097_v39 = vpop.eup %2096  ;;  %2102 = vrcp.f32 %v2832_v34  ;;  %v2846_v53 = vadd.f32 1.0, %v2095_v24  ;;  %vm804_vm1 = vmor %vm802_vm9, %vm803_vm13  ;;  %vm2850_vm2 = vcmp.eq.f32.partialorder %v1016_v35, 8.507059e+37  ;;  %v1019_v60 = vor.u32 1.1754944e-38, %v1018_v47 }
  0xf9   : > { %v799_v43 = vsub.f32 1.0, %v798_v37  ;;  %v708_v45 = vmul.f32 %v2097_v39, %v611_v19  ;;  %vm713_vm15 = vweird.f32 %v2097_v39  ;;  %2104 = vpow2.f32 %v1780_v22 }
  0xfa   : > { %v2099_v44 = vpop.eup %2098  ;;  %2106 = vpow2.f32 %v1788_v41  ;;  %vm2857_vm3 = vmor %vm712_vm11, %vm713_vm15  ;;  %v926_v2 = vand.u32 2147483647, %v2830_v33  ;;  %v928_v6 = vand.u32 2147483648, %v2830_v33  ;;  %vm817_vm5 = vweird.f32 %v2832_v34 }
  0xfb   : > { %v800_v48 = vmul.f32 %v2093_v32, %v799_v43  ;;  %v1008_v51 = vmul.f32 %v2099_v44, %v631_v25  ;;  %v709_v52 = vsub.f32 1.0, %v708_v45  ;;  %vm1013_vm0 = vweird.f32 %v2099_v44  ;;  %v2101_v23 = vpop.eup %2100 }
  0xfc   : > { %2108 = vrcp.f32 %v2846_v53  ;;  %v918_v31 = vmul.f32 %v2101_v23, %v2830_v33  ;;  %vm2866_vm4 = vmor %vm1012_vm12, %vm1013_vm0  ;;  %v821_v11 = vand.u32 2147483647, %v2832_v34  ;;  %v823_v12 = vand.u32 2147483648, %v2832_v34 }
  0xfd   : > { %v801_v54 = vadd.f32 %v2093_v32, %v800_v48  ;;  %v1009_v55 = vsub.f32 1.0, %v1008_v51  ;;  %v710_v40 = vmul.f32 %v2097_v39, %v709_v52  ;;  %vm923_vm6 = vweird.f32 %v2101_v23 }
  0xfe   : > { %v2103_v50 = vpop.eup %2102  ;;  %v919_v62 = vsub.f32 1.0, %v918_v31  ;;  %vm922_vm8 = vweird.f32 %v2830_v33  ;;  %v929_v27 = vor.u32 1.1754944e-38, %v928_v6  ;;  %v824_v29 = vor.u32 1.1754944e-38, %v823_v12 }
  0xff   : > { %v805_v58 = vsel %vm804_vm1, %v2093_v32, %v801_v54  ;;  %v1010_v59 = vmul.f32 %v2099_v44, %v1009_v55  ;;  %v711_v1 = vadd.f32 %v2097_v39, %v710_v40  ;;  %v813_v3 = vmul.f32 %v2103_v50, %v2832_v34  ;;  %v2105_v7 = vpop.eup %2104  ;;  %vm924_vm9 = vmor %vm922_vm8, %vm923_vm6 }
 0x100   : > { %v810_v0 = vsel %vm2836_vm10, %v809_v42, %v805_v58  ;;  %v2107_v14 = vpop.eup %2106  ;;  %v920_v16 = vmul.f32 %v2101_v23, %v919_v62  ;;  %vm818_vm7 = vweird.f32 %v2103_v50  ;;  %v619_v19 = vadd.f32 1.0, %v2105_v7 }
 0x101   : > { %1033 = vst [vmem:[%s2495_s15 + $0x58] sm:$0xff] %v810_v0  ;;  %v1011_v5 = vadd.f32 %v2099_v44, %v1010_v59  ;;  %v715_v9 = vsel %vm2857_vm3, %v2097_v39, %v711_v1  ;;  %v814_v15 = vsub.f32 1.0, %v813_v3  ;;  %v627_v26 = vadd.f32 1.0, %v2107_v14  ;;  %vm819_vm11 = vmor %vm817_vm5, %vm818_vm7 }
 0x102   : > { %v720_v10 = vsel %vm2842_vm14, %v719_v56, %v715_v9  ;;  %v2109_v17 = vpop.eup %2108  ;;  %v921_v21 = vadd.f32 %v2101_v23, %v920_v16  ;;  %vm927_vm10 = vcmp.eq.f32.partialorder %v926_v2, 8.507059e+37  ;;  %2110 = vrcp.f32 %v619_v19 }
 0x103   : > { %v1015_v8 = vsel %vm2866_vm4, %v2099_v44, %v1011_v5  ;;  %1027 = vst [vmem:[%s2495_s15 + $0x28] sm:$0xff] %v720_v10  ;;  %v815_v13 = vmul.f32 %v2103_v50, %v814_v15  ;;  %v933_v25 = vmul.f32 %v2109_v17, %v2846_v53  ;;  %2112 = vrcp.f32 %v627_v26 }
 0x104   : > { %v1020_v18 = vsel %vm2850_vm2, %v1019_v60, %v1015_v8  ;;  %v925_v20 = vsel %vm924_vm9, %v2101_v23, %v921_v21  ;;  %vm822_vm12 = vcmp.eq.f32.partialorder %v821_v11, 8.507059e+37  ;;  %v943_v33 = vand.u32 2147483648, %v2846_v53 }
 0x105   : > { %1047 = vst [vmem:[%s2495_s15 + $0xc8] sm:$0xff] %v1020_v18  ;;  %v816_v28 = vadd.f32 %v2103_v50, %v815_v13  ;;  %v934_v30 = vsub.f32 1.0, %v933_v25  ;;  %v930_v63 = vsel %vm927_vm10, %v929_v27, %v925_v20  ;;  %vm938_vm13 = vweird.f32 %v2109_v17 }
 0x106   : > { %1041 = vst [vmem:[%s2495_s15 + $0x98] sm:$0xff] %v930_v63  ;;  %v941_v22 = vand.u32 2147483647, %v2846_v53  ;;  %vm937_vm14 = vweird.f32 %v2846_v53  ;;  %v944_v24 = vor.u32 1.1754944e-38, %v943_v33  ;;  %v838_v45 = vand.u32 2147483648, %v619_v19 }
 0x107   : > { %v820_v32 = vsel %vm819_vm11, %v2103_v50, %v816_v28  ;;  %v935_v38 = vmul.f32 %v2109_v17, %v934_v30  ;;  %vm939_vm15 = vmor %vm937_vm14, %vm938_vm13  ;;  %v836_v48 = vand.u32 2147483647, %v619_v19  ;;  %v958_v49 = vand.u32 2147483648, %v627_v26 }
 0x108   : > { %v825_v37 = vsel %vm822_vm12, %v824_v29, %v820_v32  ;;  %v2111_v34 = vpop.eup %2110  ;;  %vm942_vm0 = vcmp.eq.f32.partialorder %v941_v22, 8.507059e+37  ;;  %v956_v52 = vand.u32 2147483647, %v627_v26  ;;  %vm832_vm3 = vweird.f32 %v619_v19 }
 0x109   : > { %1034 = vst [vmem:[%s2495_s15 + $0x60] sm:$0xff] %v825_v37  ;;  %v936_v41 = vadd.f32 %v2109_v17, %v935_v38  ;;  %v2113_v36 = vpop.eup %2112  ;;  %v828_v39 = vmul.f32 %v2111_v34, %v619_v19  ;;  %vm833_vm1 = vweird.f32 %v2111_v34  ;;  %v839_v54 = vor.u32 1.1754944e-38, %v838_v45 }
 0x10a   : > { %v948_v4 = vmul.f32 %v2113_v36, %v627_v26  ;;  %vm953_vm2 = vweird.f32 %v2113_v36  ;;  %vm834_vm4 = vmor %vm832_vm3, %vm833_vm1  ;;  %vm952_vm5 = vweird.f32 %v627_v26  ;;  %vm837_vm6 = vcmp.eq.f32.partialorder %v836_v48, 8.507059e+37 }
 0x10b   : > { %v940_v42 = vsel %vm939_vm15, %v2109_v17, %v936_v41  ;;  %v829_v44 = vsub.f32 1.0, %v828_v39  ;;  %vm954_vm7 = vmor %vm952_vm5, %vm953_vm2  ;;  %v959_v40 = vor.u32 1.1754944e-38, %v958_v49  ;;  %vm957_vm8 = vcmp.eq.f32.partialorder %v956_v52, 8.507059e+37 }
 0x10c   : > { %v945_v43 = vsel %vm942_vm0, %v944_v24, %v940_v42  ;;  %v949_v35 = vsub.f32 1.0, %v948_v4 }
 0x10d   : > { %1042 = vst [vmem:[%s2495_s15 + $0xa0] sm:$0xff] %v945_v43  ;;  %v830_v47 = vmul.f32 %v2111_v34, %v829_v44 }
 0x10e   : > { %v950_v51 = vmul.f32 %v2113_v36, %v949_v35 }
 0x10f   : > { %v831_v53 = vadd.f32 %v2111_v34, %v830_v47 }
 0x110   : > { %v951_v55 = vadd.f32 %v2113_v36, %v950_v51  ;;  %1058 = sbr.rel (!%p2351_p3) target bundleno = 350 (0x15e), region = 36 }
 0x111   : > { %v835_v23 = vsel %vm834_vm4, %v2111_v34, %v831_v53 }
 0x112   : > { %v840_v56 = vsel %vm837_vm6, %v839_v54, %v835_v23  ;;  %v955_v57 = vsel %vm954_vm7, %v2113_v36, %v951_v55 }
 0x113   : > { %1035 = vst [vmem:[%s2495_s15 + $0x68] sm:$0xff] %v840_v56  ;;  %v960_v50 = vsel %vm957_vm8, %v959_v40, %v955_v57 }
 0x114   : > { %1043 = vst [vmem:[%s2495_s15 + $0xa8] sm:$0xff] %v960_v50 }
 0x115   : > { %s3235_s20 = smov (!%p1061_p9, %s1060_s20), 26 }
 0x116   : > { %s1793_s29 = sshll.u32 %s3235_s20, 3 }
 0x117   : > { %p1796_p10 = scmp.eq.s32.totalorder %s1793_s29, 0 }
 0x118   : > { %2114 = sdivrem.u32 (!%p1796_p10), %s3235_s20, 26 }
 0x119   : > { %1069 = sbr.rel (%p1796_p10) target bundleno = 350 (0x15e), region = 40 }
 0x121   : > { %s2912_s30 = spop.drf %2114 }
 0x122   : > { %s2116_s5 = spop.drf %2114  ;;  %p1797_p11 = scmp.le.s32.totalorder %s2912_s30, 0 }
 0x123   : > { %s3218_s6 = smov (!%p1797_p11), %s2906_s27  ;;  %s3219_s7 = smov (!%p1797_p11), %s2400_s14 }
 0x124   : > { %1589 = sbr.rel (%p1797_p11) target bundleno = 324 (0x144), region = 191  ;;  %s2921_s8 = smov (!%p1797_p11), 0  }
 0x125   : > { %s2923_s9 = smov (!%p1797_p11), 0  }
 0x129 LB: >> { %v1184_v58 = vld [vmem:[%s2236_s7] sm:$0xff]  ;;  %v1186_v46 = vld [vmem:[%s2236_s7 + $0x8] sm:$0xff]  ;;  %v1188_v59 = vld [vmem:[%s2236_s7 + $0x10] sm:$0xff]  ;;  %s1236_s10 = sadd.s32 1, %s2240_s8  ;;  %s1178_s9 = sadd.s32 1, %s2244_s9   ;;  %s2244_s9 = sphi %s2923_s9, %s1178_s9   ;;  %s2240_s8 = sphi %s2921_s8, %s3222_s8   ;;  %s2236_s7 = sphi %s3219_s7, %s3221_s7   ;;  %s2232_s6 = sphi %s3218_s6, %s3220_s6  }
 0x12a   : >> { %1185 = vst [vmem:[%s2232_s6] sm:$0xff] %v1184_v58  ;;  %v1190_v60 = vld [vmem:[%s2236_s7 + $0x18] sm:$0xff]  ;;  %p1237_p12 = scmp.ge.s32.totalorder %s1236_s10, %s2912_s30  ;;  %v1192_v31 = vld [vmem:[%s2236_s7 + $0x20] sm:$0xff]  ;;  %v1194_v0 = vld [vmem:[%s2236_s7 + $0x28] sm:$0xff]  ;;  %p1177_p13 = scmp.ge.s32.totalorder %s1178_s9, %s2912_s30 }
 0x12b   : >> { %1187 = vst [vmem:[%s2232_s6 + $0x8] sm:$0xff] %v1186_v46  ;;  %v1196_v1 = vld [vmem:[%s2236_s7 + $0x30] sm:$0xff]  ;;  %v1198_v61 = vld [vmem:[%s2236_s7 + $0x38] sm:$0xff]  ;;  %v1200_v2 = vld [vmem:[%s2236_s7 + $0x40] sm:$0xff] }
 0x12c   : >> { %1189 = vst [vmem:[%s2232_s6 + $0x10] sm:$0xff] %v1188_v59  ;;  %s3237_s10 = smov (%p1237_p12, %s1236_s10), 0  ;;  %v1202_v3 = vld [vmem:[%s2236_s7 + $0x48] sm:$0xff]  ;;  %v1204_v5 = vld [vmem:[%s2236_s7 + $0x50] sm:$0xff]  ;;  %v1206_v62 = vld [vmem:[%s2236_s7 + $0x58] sm:$0xff] }
 0x12d   : >> { %1191 = vst [vmem:[%s2232_s6 + $0x18] sm:$0xff] %v1190_v60  ;;  %s1239_s11 = smul.u32 208, %s3237_s10  ;;  %v1208_v6 = vld [vmem:[%s2236_s7 + $0x60] sm:$0xff]  ;;  %v1210_v7 = vld [vmem:[%s2236_s7 + $0x68] sm:$0xff]  ;;  %v1212_v9 = vld [vmem:[%s2236_s7 + $0x70] sm:$0xff]  ;;  %s3222_s8 = smov %s3237_s10 }
 0x12e   : >> { %1193 = vst [vmem:[%s2232_s6 + $0x20] sm:$0xff] %v1192_v31  ;;  %v1214_v15 = vld [vmem:[%s2236_s7 + $0x78] sm:$0xff]  ;;  %v1216_v11 = vld [vmem:[%s2236_s7 + $0x80] sm:$0xff]  ;;  %v1218_v12 = vld [vmem:[%s2236_s7 + $0x88] sm:$0xff] }
 0x12f   : >> { %1195 = vst [vmem:[%s2232_s6 + $0x28] sm:$0xff] %v1194_v0  ;;  %s2957_s12 = scalar_lea.vmem %s2400_s14, %s1239_s11 [#allocation2]   ;;  %s2960_s13 = scalar_lea.vmem %s2906_s27, %s1239_s11   ;;  %v1220_v14 = vld [vmem:[%s2236_s7 + $0x90] sm:$0xff]  ;;  %v1222_v10 = vld [vmem:[%s2236_s7 + $0x98] sm:$0xff]  ;;  %v1224_v8 = vld [vmem:[%s2236_s7 + $0xa0] sm:$0xff] }
 0x130   : >> { %1197 = vst [vmem:[%s2232_s6 + $0x30] sm:$0xff] %v1196_v1  ;;  %v1226_v16 = vld [vmem:[%s2236_s7 + $0xa8] sm:$0xff]  ;;  %v1228_v17 = vld [vmem:[%s2236_s7 + $0xb0] sm:$0xff]  ;;  %v1230_v18 = vld [vmem:[%s2236_s7 + $0xb8] sm:$0xff] }
 0x131   : >> { %1199 = vst [vmem:[%s2232_s6 + $0x38] sm:$0xff] %v1198_v61  ;;  %v1232_v13 = vld [vmem:[%s2236_s7 + $0xc0] sm:$0xff]  ;;  %v1234_v19 = vld [vmem:[%s2236_s7 + $0xc8] sm:$0xff]  ;;  %s3221_s7 = smov %s2957_s12 }
 0x132   : >> { %1201 = vst [vmem:[%s2232_s6 + $0x40] sm:$0xff] %v1200_v2 }
 0x133   : >> { %1203 = vst [vmem:[%s2232_s6 + $0x48] sm:$0xff] %v1202_v3 }
 0x134   : >> { %1205 = vst [vmem:[%s2232_s6 + $0x50] sm:$0xff] %v1204_v5 }
 0x135   : >> { %1207 = vst [vmem:[%s2232_s6 + $0x58] sm:$0xff] %v1206_v62 }
 0x136   : >> { %1209 = vst [vmem:[%s2232_s6 + $0x60] sm:$0xff] %v1208_v6 }
 0x137   : >> { %1211 = vst [vmem:[%s2232_s6 + $0x68] sm:$0xff] %v1210_v7 }
 0x138   : >> { %1213 = vst [vmem:[%s2232_s6 + $0x70] sm:$0xff] %v1212_v9 }
 0x139   : >> { %1215 = vst [vmem:[%s2232_s6 + $0x78] sm:$0xff] %v1214_v15 }
 0x13a   : >> { %1217 = vst [vmem:[%s2232_s6 + $0x80] sm:$0xff] %v1216_v11 }
 0x13b   : >> { %1219 = vst [vmem:[%s2232_s6 + $0x88] sm:$0xff] %v1218_v12 }
 0x13c   : >> { %1221 = vst [vmem:[%s2232_s6 + $0x90] sm:$0xff] %v1220_v14 }
 0x13d   : >> { %1223 = vst [vmem:[%s2232_s6 + $0x98] sm:$0xff] %v1222_v10 }
 0x13e   : >> { %1225 = vst [vmem:[%s2232_s6 + $0xa0] sm:$0xff] %v1224_v8 }
 0x13f   : >> { %1227 = vst [vmem:[%s2232_s6 + $0xa8] sm:$0xff] %v1226_v16  ;;  %1180 = sbr.rel (!%p1177_p13) target bundleno = 297 (0x129), region = 197 }
 0x140   : >> { %1229 = vst [vmem:[%s2232_s6 + $0xb0] sm:$0xff] %v1228_v17 }
 0x141   : >> { %1231 = vst [vmem:[%s2232_s6 + $0xb8] sm:$0xff] %v1230_v18 }
 0x142   : >> { %1233 = vst [vmem:[%s2232_s6 + $0xc0] sm:$0xff] %v1232_v13 }
 0x143   : >> { %1235 = vst [vmem:[%s2232_s6 + $0xc8] sm:$0xff] %v1234_v19  ;;  %s3220_s6 = smov %s2960_s13 }
 0x144 PF: > { %2117 = sdivrem.u32 %s3235_s20, 26 }
 0x145   : > { %s1798_s22 = smul.u32 208, %s2912_s30 }
 0x147   : > { %s3013_s24 = scalar_lea.vmem %s2400_s14, %s1798_s22 [#allocation2]   ;;  %s1249_s26 = scalar_lea.vmem %s2906_s27, %s1798_s22  }
 0x14d   : > { %s2118_s29 = spop.drf %2117 }
 0x14e   : > { %s2119_s5 = spop.drf %2117 }
 0x14f   : > { %p1800_p0 = scmp.le.s32.totalorder %s2119_s5, 0 }
 0x150   : > { %s2246_s11 = smov (!%p1800_p0), %s1249_s26   ;;  %s2250_s10 = smov (!%p1800_p0), %s3013_s24  }
 0x151   : > { %1603 = sbr.rel (%p1800_p0) target bundleno = 350 (0x15e), region = 202  ;;  %s2254_s12 = smov (!%p1800_p0), 0  }
 0x152   : > { %s2258_s9 = smov (!%p1800_p0), 0  }
 0x156 LB: >> { %v1259_v21 = vld [vmem:[%s2252_s10] sm:$0xff]  ;;  %s1261_s14 = sadd.s32 1, %s2256_s12  ;;  %s1253_s9 = sadd.s32 1, %s2260_s9   ;;  %s2260_s9 = sphi %s2258_s9, %s1253_s9   ;;  %s2256_s12 = sphi %s2254_s12, %s2255_s12   ;;  %s2252_s10 = sphi %s2250_s10, %s1266_s10   ;;  %s2248_s11 = sphi %s2246_s11, %s1267_s11  }
 0x157   : >> { %1260 = vst [vmem:[%s2248_s11] sm:$0xff] %v1259_v21  ;;  %p1262_p1 = scmp.ge.s32.totalorder %s1261_s14, %s2119_s5  ;;  %p1252_p2 = scmp.ge.s32.totalorder %s1253_s9, %s2119_s5 }
 0x159   : >> { %s3239_s14 = smov (%p1262_p1, %s1261_s14), 0  ;;  %1255 = sbr.rel (!%p1252_p2) target bundleno = 342 (0x156), region = 208 }
 0x15a   : >> { %s1801_s20 = sshll.u32 %s3239_s14, 3  ;;  %s2255_s12 = smov %s3239_s14  }
 0x15b   : >> { %s1266_s10 = scalar_lea.vmem %s3013_s24, %s1801_s20 [#allocation2]   ;;  %s1267_s11 = scalar_lea.vmem %s1249_s26, %s1801_s20  }
 0x15e PF: > { %1273 = sbr.rel (!%p2351_p3) target bundleno = 428 (0x1ac), region = 88  ;;  %s1275_s27 = ssub.s32 (%p2351_p3), 49, %s2366_s28 }
 0x15f   : > { %s1831_s30 = smul.u32 (%p2351_p3), 208, %s2220_s17  ;;  %p1276_p4 = scmp.lt.s32.totalorder (%p2351_p3), %s1275_s27, 26 }
 0x161   : > { %s3025_s8 = scalar_lea.vmem (%p2351_p3), %s3156_s4, %s1831_s30  }
 0x163   : > { %s3241_s27 = smov (!%p1276_p4, %s1275_s27), 26 }
 0x164   : > { %s1803_s13 = sshll.u32 %s3241_s27, 3 }
 0x165   : > { %p1806_p5 = scmp.eq.s32.totalorder %s1803_s13, 0 }
 0x166   : > { %2120 = sdivrem.u32 (!%p1806_p5), %s3241_s27, 26 }
 0x167   : > { %1284 = sbr.rel (%p1806_p5) target bundleno = 428 (0x1ac), region = 92 }
 0x16f   : > { %s3031_s23 = spop.drf %2120 }
 0x170   : > { %s2122_s22 = spop.drf %2120  ;;  %p1807_p3 = scmp.le.s32.totalorder %s3031_s23, 0 }
 0x171   : > { %s3223_s17 = smov (!%p1807_p3), %s3025_s8  ;;  %s3224_s28 = smov (!%p1807_p3), %s2495_s15 }
 0x172   : > { %1617 = sbr.rel (%p1807_p3) target bundleno = 402 (0x192), region = 213  ;;  %s3040_s24 = smov (!%p1807_p3), 0  }
 0x173   : > { %s3042_s26 = smov (!%p1807_p3), 0  }
 0x177 LB: >> { %v1399_v25 = vld [vmem:[%s2268_s28] sm:$0xff]  ;;  %v1401_v26 = vld [vmem:[%s2268_s28 + $0x8] sm:$0xff]  ;;  %v1403_v27 = vld [vmem:[%s2268_s28 + $0x10] sm:$0xff]  ;;  %s1451_s29 = sadd.s32 1, %s2272_s24  ;;  %s1393_s26 = sadd.s32 1, %s2276_s26   ;;  %s2276_s26 = sphi %s3042_s26, %s1393_s26   ;;  %s2272_s24 = sphi %s3040_s24, %s3227_s24   ;;  %s2268_s28 = sphi %s3224_s28, %s3226_s28   ;;  %s2264_s17 = sphi %s3223_s17, %s3225_s17  }
 0x178   : >> { %1400 = vst [vmem:[%s2264_s17] sm:$0xff] %v1399_v25  ;;  %v1405_v28 = vld [vmem:[%s2268_s28 + $0x18] sm:$0xff]  ;;  %p1452_p6 = scmp.ge.s32.totalorder %s1451_s29, %s3031_s23  ;;  %v1407_v20 = vld [vmem:[%s2268_s28 + $0x20] sm:$0xff]  ;;  %v1409_v29 = vld [vmem:[%s2268_s28 + $0x28] sm:$0xff]  ;;  %p1392_p7 = scmp.ge.s32.totalorder %s1393_s26, %s3031_s23 }
 0x179   : >> { %1402 = vst [vmem:[%s2264_s17 + $0x8] sm:$0xff] %v1401_v26  ;;  %v1411_v30 = vld [vmem:[%s2268_s28 + $0x30] sm:$0xff]  ;;  %v1413_v63 = vld [vmem:[%s2268_s28 + $0x38] sm:$0xff]  ;;  %v1415_v32 = vld [vmem:[%s2268_s28 + $0x40] sm:$0xff] }
 0x17a   : >> { %1404 = vst [vmem:[%s2264_s17 + $0x10] sm:$0xff] %v1403_v27  ;;  %s3243_s29 = smov (%p1452_p6, %s1451_s29), 0  ;;  %v1417_v33 = vld [vmem:[%s2268_s28 + $0x48] sm:$0xff]  ;;  %v1419_v37 = vld [vmem:[%s2268_s28 + $0x50] sm:$0xff]  ;;  %v1421_v38 = vld [vmem:[%s2268_s28 + $0x58] sm:$0xff] }
 0x17b   : >> { %1406 = vst [vmem:[%s2264_s17 + $0x18] sm:$0xff] %v1405_v28  ;;  %s1454_s5 = smul.u32 208, %s3243_s29  ;;  %v1423_v22 = vld [vmem:[%s2268_s28 + $0x60] sm:$0xff]  ;;  %v1425_v41 = vld [vmem:[%s2268_s28 + $0x68] sm:$0xff]  ;;  %v1427_v34 = vld [vmem:[%s2268_s28 + $0x70] sm:$0xff]  ;;  %s3227_s24 = smov %s3243_s29 }
 0x17c   : >> { %1408 = vst [vmem:[%s2264_s17 + $0x20] sm:$0xff] %v1407_v20  ;;  %v1429_v24 = vld [vmem:[%s2268_s28 + $0x78] sm:$0xff]  ;;  %v1431_v36 = vld [vmem:[%s2268_s28 + $0x80] sm:$0xff]  ;;  %v1433_v42 = vld [vmem:[%s2268_s28 + $0x88] sm:$0xff] }
 0x17d   : >> { %1410 = vst [vmem:[%s2264_s17 + $0x28] sm:$0xff] %v1409_v29  ;;  %s3076_s11 = scalar_lea.vmem %s2495_s15, %s1454_s5 [#allocation3]   ;;  %s3079_s10 = scalar_lea.vmem %s3025_s8, %s1454_s5   ;;  %v1435_v39 = vld [vmem:[%s2268_s28 + $0x90] sm:$0xff]  ;;  %v1437_v43 = vld [vmem:[%s2268_s28 + $0x98] sm:$0xff]  ;;  %v1439_v4 = vld [vmem:[%s2268_s28 + $0xa0] sm:$0xff] }
 0x17e   : >> { %1412 = vst [vmem:[%s2264_s17 + $0x30] sm:$0xff] %v1411_v30  ;;  %v1441_v44 = vld [vmem:[%s2268_s28 + $0xa8] sm:$0xff]  ;;  %v1443_v45 = vld [vmem:[%s2268_s28 + $0xb0] sm:$0xff]  ;;  %v1445_v35 = vld [vmem:[%s2268_s28 + $0xb8] sm:$0xff] }
 0x17f   : >> { %1414 = vst [vmem:[%s2264_s17 + $0x38] sm:$0xff] %v1413_v63  ;;  %v1447_v47 = vld [vmem:[%s2268_s28 + $0xc0] sm:$0xff]  ;;  %v1449_v48 = vld [vmem:[%s2268_s28 + $0xc8] sm:$0xff]  ;;  %s3226_s28 = smov %s3076_s11 }
 0x180   : >> { %1416 = vst [vmem:[%s2264_s17 + $0x40] sm:$0xff] %v1415_v32 }
 0x181   : >> { %1418 = vst [vmem:[%s2264_s17 + $0x48] sm:$0xff] %v1417_v33 }
 0x182   : >> { %1420 = vst [vmem:[%s2264_s17 + $0x50] sm:$0xff] %v1419_v37 }
 0x183   : >> { %1422 = vst [vmem:[%s2264_s17 + $0x58] sm:$0xff] %v1421_v38 }
 0x184   : >> { %1424 = vst [vmem:[%s2264_s17 + $0x60] sm:$0xff] %v1423_v22 }
 0x185   : >> { %1426 = vst [vmem:[%s2264_s17 + $0x68] sm:$0xff] %v1425_v41 }
 0x186   : >> { %1428 = vst [vmem:[%s2264_s17 + $0x70] sm:$0xff] %v1427_v34 }
 0x187   : >> { %1430 = vst [vmem:[%s2264_s17 + $0x78] sm:$0xff] %v1429_v24 }
 0x188   : >> { %1432 = vst [vmem:[%s2264_s17 + $0x80] sm:$0xff] %v1431_v36 }
 0x189   : >> { %1434 = vst [vmem:[%s2264_s17 + $0x88] sm:$0xff] %v1433_v42 }
 0x18a   : >> { %1436 = vst [vmem:[%s2264_s17 + $0x90] sm:$0xff] %v1435_v39 }
 0x18b   : >> { %1438 = vst [vmem:[%s2264_s17 + $0x98] sm:$0xff] %v1437_v43 }
 0x18c   : >> { %1440 = vst [vmem:[%s2264_s17 + $0xa0] sm:$0xff] %v1439_v4 }
 0x18d   : >> { %1442 = vst [vmem:[%s2264_s17 + $0xa8] sm:$0xff] %v1441_v44  ;;  %1395 = sbr.rel (!%p1392_p7) target bundleno = 375 (0x177), region = 219 }
 0x18e   : >> { %1444 = vst [vmem:[%s2264_s17 + $0xb0] sm:$0xff] %v1443_v45 }
 0x18f   : >> { %1446 = vst [vmem:[%s2264_s17 + $0xb8] sm:$0xff] %v1445_v35 }
 0x190   : >> { %1448 = vst [vmem:[%s2264_s17 + $0xc0] sm:$0xff] %v1447_v47 }
 0x191   : >> { %1450 = vst [vmem:[%s2264_s17 + $0xc8] sm:$0xff] %v1449_v48  ;;  %s3225_s17 = smov %s3079_s10 }
 0x192 PF: > { %2123 = sdivrem.u32 %s3241_s27, 26 }
 0x193   : > { %s1808_s12 = smul.u32 208, %s3031_s23 }
 0x195   : > { %s3132_s9 = scalar_lea.vmem %s2495_s15, %s1808_s12 [#allocation3]   ;;  %s1464_s14 = scalar_lea.vmem %s3025_s8, %s1808_s12  }
 0x19b   : > { %s2124_s20 = spop.drf %2123 }
 0x19c   : > { %s2125_s30 = spop.drf %2123 }
 0x19d   : > { %p1810_p8 = scmp.le.s32.totalorder %s2125_s30, 0 }
 0x19e   : > { %s2278_s6 = smov (!%p1810_p8), %s1464_s14   ;;  %s2282_s7 = smov (!%p1810_p8), %s3132_s9  }
 0x19f   : > { %1631 = sbr.rel (%p1810_p8) target bundleno = 428 (0x1ac), region = 224  ;;  %s2286_s13 = smov (!%p1810_p8), 0  }
 0x1a0   : > { %s2290_s22 = smov (!%p1810_p8), 0  }
 0x1a4 LB: >> { %v1474_v49 = vld [vmem:[%s2284_s7] sm:$0xff]  ;;  %s1476_s15 = sadd.s32 1, %s2288_s13  ;;  %s1468_s22 = sadd.s32 1, %s2292_s22   ;;  %s2292_s22 = sphi %s2290_s22, %s1468_s22   ;;  %s2288_s13 = sphi %s2286_s13, %s2287_s13   ;;  %s2284_s7 = sphi %s2282_s7, %s1481_s7   ;;  %s2280_s6 = sphi %s2278_s6, %s1482_s6  }
 0x1a5   : >> { %1475 = vst [vmem:[%s2280_s6] sm:$0xff] %v1474_v49  ;;  %p1477_p9 = scmp.ge.s32.totalorder %s1476_s15, %s2125_s30  ;;  %p1467_p10 = scmp.ge.s32.totalorder %s1468_s22, %s2125_s30 }
 0x1a7   : >> { %s3245_s15 = smov (%p1477_p9, %s1476_s15), 0  ;;  %1470 = sbr.rel (!%p1467_p10) target bundleno = 420 (0x1a4), region = 230 }
 0x1a8   : >> { %s1811_s27 = sshll.u32 %s3245_s15, 3  ;;  %s2287_s13 = smov %s3245_s15  }
 0x1a9   : >> { %s1481_s7 = scalar_lea.vmem %s3132_s9, %s1811_s27 [#allocation3]   ;;  %s1482_s6 = scalar_lea.vmem %s1464_s14, %s1811_s27  }
 0x1ac PF: > { %s15_s19 = sadd.s32 1, %s2228_s19   ;;  %s3228_s15 = smov %s2216_s16 }
 0x1ad   : > { %p12_p11 = scmp.ge.s32.totalorder %s15_s19, 4   ;;  %s3229_s16 = smov %s2360_s25 }
 0x1ae   : > { %s3230_s17 = smov %s2224_s18  ;;  %s3231_s18 = smov %s3233_s21 }
 0x1af   :  { %14 = sbr.rel (!%p12_p11) target bundleno = 3 (0x3), region = 241 }

</bundles_post_ra>
